<compile_context>
chip_gen: v6e
topology: v6e:2x2x1
jax: 0.10.0
libtpu: 0.0.40
codegen_flags: <defaults>
</compile_context>

<pallas_src>
import math

import jax
import jax.numpy as jnp
from jax.experimental import pallas as pl
from jax.experimental.pallas import tpu as pltpu

d_k = d_v = 64
d_model = 512
n_heads = 4


def _round_up(x, m):
    return -(-x // m) * m


def _row_tile(m):
    # Cap at 256 rows: near the HBM-roofline plateau and comfortably inside
    # v5e's 16 MiB default scoped VMEM.  Small inputs round up to a sublane
    # multiple; the partial tail block is handled by Pallas (cdiv grid).
    return 256 if m >= 256 else _round_up(max(m, 8), 8)


def _q_tile(lq):
    # Query-tile for the attention kernel (keeps per-step footprint ~H*TQ*Lk).
    return 128 if lq >= 128 else _round_up(max(lq, 8), 8)


# --------------------------- kernel 1: QKV projections ----------------------

def _qkv_proj_kernel(q_ref, k_ref, v_ref, wq_ref, wk_ref, wv_ref, b_ref,
                     q2_ref, k2_ref, v2_ref):
    # bf16 MXU operands, f32 accumulation, bf16 stores.
    q2_ref[...] = (
        jnp.dot(q_ref[...].astype(jnp.bfloat16), wq_ref[...],
                preferred_element_type=jnp.float32) + b_ref[0:1, :]
    ).astype(q2_ref.dtype)
    k2_ref[...] = (
        jnp.dot(k_ref[...].astype(jnp.bfloat16), wk_ref[...],
                preferred_element_type=jnp.float32) + b_ref[1:2, :]
    ).astype(k2_ref.dtype)
    v2_ref[...] = (
        jnp.dot(v_ref[...].astype(jnp.bfloat16), wv_ref[...],
                preferred_element_type=jnp.float32) + b_ref[2:3, :]
    ).astype(v2_ref.dtype)


def qkv_projection(q2d, k2d, v2d, wq_t, wk_t, wv_t, b3):
    """q2d/k2d/v2d: (M, 512) f32; w*_t: (512, 256) bf16; b3: (3, 256) f32
    -> three (M, 256) bf16."""
    m, kin = q2d.shape
    nout = wq_t.shape[1]
    tm = _row_tile(m)
    row_spec = pl.BlockSpec((tm, kin), lambda i: (i, 0))
    w_spec = pl.BlockSpec((kin, nout), lambda i: (0, 0))           # resident
    out_spec = pl.BlockSpec((tm, nout), lambda i: (i, 0))
    return pl.pallas_call(
        _qkv_proj_kernel,
        out_shape=tuple(
            jax.ShapeDtypeStruct((m, nout), jnp.bfloat16) for _ in range(3)),
        grid=(pl.cdiv(m, tm),),
        in_specs=[row_spec, row_spec, row_spec, w_spec, w_spec, w_spec,
                  pl.BlockSpec((3, nout), lambda i: (0, 0))],
        out_specs=(out_spec, out_spec, out_spec),
        compiler_params=pltpu.CompilerParams(dimension_semantics=("parallel",)),
    )(q2d, k2d, v2d, wq_t, wk_t, wv_t, b3)


# -------------- kernel 2: attention + fc + residual + LayerNorm -------------

def _attn_out_kernel(q_ref, k_ref, v_ref, m_ref, res_ref, wfc_ref, bfc_ref,
                     g_ref, beta_ref, out_ref, attn_ref, ctx_scratch):
    # One (batch element, query tile) per grid step; all H heads together.
    # 1/sqrt(d_k) is already folded into W_Q / b_q.
    q = q_ref[0]                                   # (H, TQ, d_k)  bf16
    k = k_ref[0]                                   # (H, Lk, d_k)  bf16
    v = v_ref[0]                                   # (H, Lk, d_v)  bf16
    mask = m_ref[0, 0] != 0                        # (TQ, Lk), shared by heads

    # scores[h] = q[h] @ k[h]^T  (contract last dims; no materialized K^T)
    scores = jnp.einsum("hqd,hkd->hqk", q, k,
                        preferred_element_type=jnp.float32)        # (H,TQ,Lk)
    scores = jnp.where(mask[None, :, :], jnp.float32(-1e9), scores)

    mx = jnp.max(scores, axis=-1, keepdims=True)
    e = jnp.exp(scores - mx)
    s = jnp.sum(e, axis=-1, keepdims=True)
    p = e * pl.reciprocal(s, approx=True)                          # softmax
    attn_ref[0] = p.astype(attn_ref.dtype)                         # bf16 store

    ctx = jnp.einsum("hqk,hkd->hqd", p.astype(jnp.bfloat16), v,
                     preferred_element_type=jnp.float32)           # (H,TQ,d_v)

    # Lay the heads out lane-contiguously (token-major, head0|head1|... per
    # row) so fc is a single 256-deep MXU matmul instead of four K=64 ones.
    for h in range(n_heads):
        ctx_scratch[:, h * d_v:(h + 1) * d_v] = ctx[h]

    y = (res_ref[0] + bfc_ref[...]
         + jnp.dot(ctx_scratch[...].astype(jnp.bfloat16), wfc_ref[...],
                   preferred_element_type=jnp.float32))            # (TQ, 512)

    # LayerNorm over d_model (eps matches nn.LayerNorm default).
    mean = jnp.mean(y, axis=-1, keepdims=True)
    var = jnp.mean(jnp.square(y - mean), axis=-1, keepdims=True)
    out_ref[0] = (y - mean) * jax.lax.rsqrt(var + 1e-5) * g_ref[...] + beta_ref[...]


def attention_fc_layernorm(q_s, k_s, v_s, mask_i8, residual, wfc_t, bfc,
                           gamma, beta):
    """q_s/k_s/v_s: (B, H, L, 64) bf16; mask_i8: (B, 1, L, L) int8;
    residual: (B, L, 512) f32; wfc_t: (256, 512) bf16; bfc/gamma/beta: (1, 512).
    Returns (out f32, attn bf16)."""
    b, h, lq, dk = q_s.shape
    lk = k_s.shape[2]
    dv = v_s.shape[3]
    dm = residual.shape[-1]
    tq = _q_tile(lq)
    return pl.pallas_call(
        _attn_out_kernel,
        out_shape=(
            jax.ShapeDtypeStruct((b, lq, dm), jnp.float32),
            jax.ShapeDtypeStruct((b, h, lq, lk), jnp.bfloat16),
        ),
        grid=(b, pl.cdiv(lq, tq)),                    # q-tile axis innermost:
        in_specs=[                                    # K/V block stays resident
            pl.BlockSpec((1, h, tq, dk), lambda i, j: (i, 0, j, 0)),
            pl.BlockSpec((1, h, lk, dk), lambda i, j: (i, 0, 0, 0)),
            pl.BlockSpec((1, h, lk, dv), lambda i, j: (i, 0, 0, 0)),
            pl.BlockSpec((1, 1, tq, lk), lambda i, j: (i, 0, j, 0)),   # int8 mask
            pl.BlockSpec((1, tq, dm), lambda i, j: (i, j, 0)),
            pl.BlockSpec((h * dv, dm), lambda i, j: (0, 0)),           # resident
            pl.BlockSpec((1, dm), lambda i, j: (0, 0)),
            pl.BlockSpec((1, dm), lambda i, j: (0, 0)),
            pl.BlockSpec((1, dm), lambda i, j: (0, 0)),
        ],
        out_specs=(
            pl.BlockSpec((1, tq, dm), lambda i, j: (i, j, 0)),   # lane-dense 512
            pl.BlockSpec((1, h, tq, lk), lambda i, j: (i, 0, j, 0)),
        ),
        scratch_shapes=[pltpu.VMEM((tq, h * dv), jnp.float32)],
        compiler_params=pltpu.CompilerParams(
            dimension_semantics=("parallel", "parallel"),
            vmem_limit_bytes=48 * 1024 * 1024),
    )(q_s, k_s, v_s, mask_i8, residual, wfc_t, bfc, gamma, beta)


# ------------------------------ module wrapper ------------------------------

def init_params(key):
    ks = jax.random.split(key, 8)
    scale = 0.02
    # Weights stored pre-transposed to (in, out); same forward semantics as the
    # PyTorch nn.Linear (out, in) layout, just no per-call transpose.
    return {
        "wq_t": scale * jax.random.normal(ks[0], (d_model, d_k * n_heads), jnp.float32),
        "bq": scale * jax.random.normal(ks[1], (d_k * n_heads,), jnp.float32),
        "wk_t": scale * jax.random.normal(ks[2], (d_model, d_k * n_heads), jnp.float32),
        "bk": scale * jax.random.normal(ks[3], (d_k * n_heads,), jnp.float32),
        "wv_t": scale * jax.random.normal(ks[4], (d_model, d_v * n_heads), jnp.float32),
        "bv": scale * jax.random.normal(ks[5], (d_v * n_heads,), jnp.float32),
        "wfc_t": scale * jax.random.normal(ks[6], (n_heads * d_v, d_model), jnp.float32),
        "bfc": scale * jax.random.normal(ks[7], (d_model,), jnp.float32),
        "gamma": jnp.ones((d_model,), jnp.float32),   # nn.LayerNorm default init
        "beta": jnp.zeros((d_model,), jnp.float32),
    }


def multi_head_attention(params, Q, K, V, attn_mask):
    """Q/K/V: (B, L, d_model) f32; attn_mask: (B, 1, L, L) bool.
    Returns (out f32, attn bf16)."""
    B, Lq, _ = Q.shape
    Lk = Lq

    inv = jnp.float32(1.0 / math.sqrt(d_k))
    # Fold 1/sqrt(d_k) into W_Q / b_q (one-time weight transform) and cast the
    # projection weights to bf16 MXU operands (accumulation stays f32).
    wq_t = (params["wq_t"] * inv).astype(jnp.bfloat16)
    wk_t = params["wk_t"].astype(jnp.bfloat16)
    wv_t = params["wv_t"].astype(jnp.bfloat16)
    b3 = jnp.stack([params["bq"] * inv, params["bk"], params["bv"]])  # (3, 256)

    q2, k2, v2 = qkv_projection(
        Q.reshape(B * Lq, d_model), K.reshape(B * Lk, d_model),
        V.reshape(B * Lk, d_model), wq_t, wk_t, wv_t, b3)

    # Exactly mirrors `.view(batch, -1, len, d_k)` on contiguous data
    # (free row-major reshape, heads interleaved with tokens as in the module).
    q_s = q2.reshape(B, n_heads, Lq, d_k)
    k_s = k2.reshape(B, n_heads, Lk, d_k)
    v_s = v2.reshape(B, n_heads, Lk, d_v)

    # Mask passed un-broadcast (B, 1, L, L) as int8 (4x less DMA/VMEM vs int32).
    mask_i8 = attn_mask.astype(jnp.int8)

    out, attn = attention_fc_layernorm(
        q_s, k_s, v_s, mask_i8, Q,
        params["wfc_t"].astype(jnp.bfloat16),
        params["bfc"].reshape(1, d_model),
        params["gamma"].reshape(1, d_model),
        params["beta"].reshape(1, d_model))
    return out, attn


# --------------------------- pure-JAX reference -----------------------------

def reference(params, Q, K, V, attn_mask):
    B, L, _ = Q.shape
    q = (Q @ params["wq_t"] + params["bq"]).reshape(B, n_heads, L, d_k)
    k = (K @ params["wk_t"] + params["bk"]).reshape(B, n_heads, L, d_k)
    v = (V @ params["wv_t"] + params["bv"]).reshape(B, n_heads, L, d_v)
    mask = jnp.broadcast_to(attn_mask, (B, n_heads, L, L))
    scores = jnp.einsum("bhqd,bhkd->bhqk", q, k) / jnp.sqrt(jnp.float32(d_k))
    scores = jnp.where(mask, jnp.float32(-1e9), scores)
    attn = jax.nn.softmax(scores, axis=-1)
    ctx = jnp.einsum("bhqk,bhkd->bhqd", attn, v)
    ctx = jnp.transpose(ctx, (0, 2, 1, 3)).reshape(B, L, n_heads * d_v)
    out = ctx @ params["wfc_t"] + params["bfc"] + Q
    mean = jnp.mean(out, axis=-1, keepdims=True)
    var = jnp.mean(jnp.square(out - mean), axis=-1, keepdims=True)
    out = (out - mean) * jax.lax.rsqrt(var + 1e-5) * params["gamma"] + params["beta"]
    return out, attn


# ----------------------------------- main -----------------------------------

if __name__ == "__main__":
    B, L = 2, 8
    key = jax.random.PRNGKey(0)
    kq, kk, kv, kp = jax.random.split(key, 4)

    Q = jax.random.normal(kq, (B, L, d_model), jnp.float32)
    K = jax.random.normal(kk, (B, L, d_model), jnp.float32)
    V = jax.random.normal(kv, (B, L, d_model), jnp.float32)
    # Padding mask: last 2 key positions masked out for every query.
    key_pad = jnp.arange(L) >= (L - 2)
    attn_mask = jnp.broadcast_to(key_pad[None, None, None, :], (B, 1, L, L))

    params = init_params(kp)

    mha = jax.jit(multi_head_attention)
    out, attn = mha(params, Q, K, V, attn_mask)
    out = jax.block_until_ready(out)
    attn = jax.block_until_ready(attn)

    out_ref, attn_ref = reference(params, Q, K, V, attn_mask)
    assert out.shape == (B, L, d_model) and attn.shape == (B, n_heads, L, L)
    # Tolerances account for bf16 MXU operands, bf16-stored attention
    # probabilities, and the EUP approx reciprocal in the softmax.
    attn_f32 = attn.astype(jnp.float32)
    assert jnp.allclose(attn_f32, attn_ref, atol=1e-2, rtol=1e-2), float(
        jnp.max(jnp.abs(attn_f32 - attn_ref)))
    assert jnp.allclose(out, out_ref, atol=1e-2, rtol=1e-2), float(
        jnp.max(jnp.abs(out - out_ref)))

    print("KERNEL_OK")
</pallas_src>

<mosaic_0001>
module attributes {stable_mosaic.version = 11 : i64} {
  func.func @_qkv_proj_kernel(%arg0: i32, %arg1: memref<16x512xf32, #tpu.memory_space<vmem>>, %arg2: memref<16x512xf32, #tpu.memory_space<vmem>>, %arg3: memref<16x512xf32, #tpu.memory_space<vmem>>, %arg4: memref<512x256xbf16, #tpu.memory_space<vmem>>, %arg5: memref<512x256xbf16, #tpu.memory_space<vmem>>, %arg6: memref<512x256xbf16, #tpu.memory_space<vmem>>, %arg7: memref<3x256xf32, #tpu.memory_space<vmem>>, %arg8: memref<16x256xbf16, #tpu.memory_space<vmem>>, %arg9: memref<16x256xbf16, #tpu.memory_space<vmem>>, %arg10: memref<16x256xbf16, #tpu.memory_space<vmem>>) attributes {dimension_semantics = [#tpu.dimension_semantics<parallel>], iteration_bounds = array<i64: 1>, scalar_prefetch = 0 : i64, scratch_operands = 0 : i64, tpu.core_type = #tpu.core_type<tc>, window_params = [{transform_indices = @transform_0, window_bounds = array<i64: 16, 512>}, {transform_indices = @transform_1, window_bounds = array<i64: 16, 512>}, {transform_indices = @transform_2, window_bounds = array<i64: 16, 512>}, {pipeline_mode = #tpu.pipeline_mode<synchronous>, transform_indices = @transform_3, window_bounds = array<i64: 512, 256>}, {pipeline_mode = #tpu.pipeline_mode<synchronous>, transform_indices = @transform_4, window_bounds = array<i64: 512, 256>}, {pipeline_mode = #tpu.pipeline_mode<synchronous>, transform_indices = @transform_5, window_bounds = array<i64: 512, 256>}, {pipeline_mode = #tpu.pipeline_mode<synchronous>, transform_indices = @transform_6, window_bounds = array<i64: 3, 256>}, {transform_indices = @transform_7, window_bounds = array<i64: 16, 256>}, {transform_indices = @transform_8, window_bounds = array<i64: 16, 256>}, {transform_indices = @transform_9, window_bounds = array<i64: 16, 256>}]} {
    %c0 = arith.constant 0 : index
    %c0_0 = arith.constant 0 : index
    %0 = vector.load %arg1[%c0, %c0_0] : memref<16x512xf32, #tpu.memory_space<vmem>>, vector<16x512xf32>
    %1 = arith.truncf %0 : vector<16x512xf32> to vector<16x512xbf16>
    %c0_1 = arith.constant 0 : index
    %c0_2 = arith.constant 0 : index
    %2 = vector.load %arg4[%c0_1, %c0_2] : memref<512x256xbf16, #tpu.memory_space<vmem>>, vector<512x256xbf16>
    %cst = arith.constant dense<0.000000e+00> : vector<16x256xf32>
    %3 = tpu.matmul %1, %2, %cst {dimension_numbers = #tpu.dot_dimension_numbers<[1], [0], [0], [1], [0, 0, 1, 1], [], []>} : vector<16x512xbf16>, vector<512x256xbf16>, vector<16x256xf32> -> vector<16x256xf32>
    %c0_3 = arith.constant 0 : index
    %c0_4 = arith.constant 0 : index
    %4 = vector.load %arg7[%c0_3, %c0_4] : memref<3x256xf32, #tpu.memory_space<vmem>>, vector<1x256xf32>
    %5 = vector.broadcast %4 : vector<1x256xf32> to vector<16x256xf32>
    %6 = arith.addf %3, %5 : vector<16x256xf32>
    %7 = arith.truncf %6 : vector<16x256xf32> to vector<16x256xbf16>
    %c0_5 = arith.constant 0 : index
    %c0_6 = arith.constant 0 : index
    %8 = vector.load %arg8[%c0_5, %c0_6] : memref<16x256xbf16, #tpu.memory_space<vmem>>, vector<16x256xbf16>
    tpu.vector_store %arg8[%c0_5, %c0_6], %7 {strides = array<i32>} : memref<16x256xbf16, #tpu.memory_space<vmem>>, vector<16x256xbf16>,
    %c0_7 = arith.constant 0 : index
    %c0_8 = arith.constant 0 : index
    %9 = vector.load %arg2[%c0_7, %c0_8] : memref<16x512xf32, #tpu.memory_space<vmem>>, vector<16x512xf32>
    %10 = arith.truncf %9 : vector<16x512xf32> to vector<16x512xbf16>
    %c0_9 = arith.constant 0 : index
    %c0_10 = arith.constant 0 : index
    %11 = vector.load %arg5[%c0_9, %c0_10] : memref<512x256xbf16, #tpu.memory_space<vmem>>, vector<512x256xbf16>
    %cst_11 = arith.constant dense<0.000000e+00> : vector<16x256xf32>
    %12 = tpu.matmul %10, %11, %cst_11 {dimension_numbers = #tpu.dot_dimension_numbers<[1], [0], [0], [1], [0, 0, 1, 1], [], []>} : vector<16x512xbf16>, vector<512x256xbf16>, vector<16x256xf32> -> vector<16x256xf32>
    %c1 = arith.constant 1 : index
    %c0_12 = arith.constant 0 : index
    %13 = vector.load %arg7[%c1, %c0_12] : memref<3x256xf32, #tpu.memory_space<vmem>>, vector<1x256xf32>
    %14 = vector.broadcast %13 : vector<1x256xf32> to vector<16x256xf32>
    %15 = arith.addf %12, %14 : vector<16x256xf32>
    %16 = arith.truncf %15 : vector<16x256xf32> to vector<16x256xbf16>
    %c0_13 = arith.constant 0 : index
    %c0_14 = arith.constant 0 : index
    %17 = vector.load %arg9[%c0_13, %c0_14] : memref<16x256xbf16, #tpu.memory_space<vmem>>, vector<16x256xbf16>
    tpu.vector_store %arg9[%c0_13, %c0_14], %16 {strides = array<i32>} : memref<16x256xbf16, #tpu.memory_space<vmem>>, vector<16x256xbf16>,
    %c0_15 = arith.constant 0 : index
    %c0_16 = arith.constant 0 : index
    %18 = vector.load %arg3[%c0_15, %c0_16] : memref<16x512xf32, #tpu.memory_space<vmem>>, vector<16x512xf32>
    %19 = arith.truncf %18 : vector<16x512xf32> to vector<16x512xbf16>
    %c0_17 = arith.constant 0 : index
    %c0_18 = arith.constant 0 : index
    %20 = vector.load %arg6[%c0_17, %c0_18] : memref<512x256xbf16, #tpu.memory_space<vmem>>, vector<512x256xbf16>
    %cst_19 = arith.constant dense<0.000000e+00> : vector<16x256xf32>
    %21 = tpu.matmul %19, %20, %cst_19 {dimension_numbers = #tpu.dot_dimension_numbers<[1], [0], [0], [1], [0, 0, 1, 1], [], []>} : vector<16x512xbf16>, vector<512x256xbf16>, vector<16x256xf32> -> vector<16x256xf32>
    %c2 = arith.constant 2 : index
    %c0_20 = arith.constant 0 : index
    %22 = vector.load %arg7[%c2, %c0_20] : memref<3x256xf32, #tpu.memory_space<vmem>>, vector<1x256xf32>
    %23 = vector.broadcast %22 : vector<1x256xf32> to vector<16x256xf32>
    %24 = arith.addf %21, %23 : vector<16x256xf32>
    %25 = arith.truncf %24 : vector<16x256xf32> to vector<16x256xbf16>
    %c0_21 = arith.constant 0 : index
    %c0_22 = arith.constant 0 : index
    %26 = vector.load %arg10[%c0_21, %c0_22] : memref<16x256xbf16, #tpu.memory_space<vmem>>, vector<16x256xbf16>
    tpu.vector_store %arg10[%c0_21, %c0_22], %25 {strides = array<i32>} : memref<16x256xbf16, #tpu.memory_space<vmem>>, vector<16x256xbf16>,
    return
  }
  func.func @transform_0(%arg0: i32) -> (i32, i32) {
    %c0_i32 = arith.constant 0 : i32
    %c0_i32_0 = arith.constant 0 : i32
    return %arg0, %c0_i32 : i32, i32
  }
  func.func @transform_1(%arg0: i32) -> (i32, i32) {
    %c0_i32 = arith.constant 0 : i32
    %c0_i32_0 = arith.constant 0 : i32
    return %arg0, %c0_i32 : i32, i32
  }
  func.func @transform_2(%arg0: i32) -> (i32, i32) {
    %c0_i32 = arith.constant 0 : i32
    %c0_i32_0 = arith.constant 0 : i32
    return %arg0, %c0_i32 : i32, i32
  }
  func.func @transform_3(%arg0: i32) -> (i32, i32) {
    %c0_i32 = arith.constant 0 : i32
    %c0_i32_0 = arith.constant 0 : i32
    %c0_i32_1 = arith.constant 0 : i32
    return %c0_i32, %c0_i32_0 : i32, i32
  }
  func.func @transform_4(%arg0: i32) -> (i32, i32) {
    %c0_i32 = arith.constant 0 : i32
    %c0_i32_0 = arith.constant 0 : i32
    %c0_i32_1 = arith.constant 0 : i32
    return %c0_i32, %c0_i32_0 : i32, i32
  }
  func.func @transform_5(%arg0: i32) -> (i32, i32) {
    %c0_i32 = arith.constant 0 : i32
    %c0_i32_0 = arith.constant 0 : i32
    %c0_i32_1 = arith.constant 0 : i32
    return %c0_i32, %c0_i32_0 : i32, i32
  }
  func.func @transform_6(%arg0: i32) -> (i32, i32) {
    %c0_i32 = arith.constant 0 : i32
    %c0_i32_0 = arith.constant 0 : i32
    %c0_i32_1 = arith.constant 0 : i32
    return %c0_i32, %c0_i32_0 : i32, i32
  }
  func.func @transform_7(%arg0: i32) -> (i32, i32) {
    %c0_i32 = arith.constant 0 : i32
    %c0_i32_0 = arith.constant 0 : i32
    return %arg0, %c0_i32 : i32, i32
  }
  func.func @transform_8(%arg0: i32) -> (i32, i32) {
    %c0_i32 = arith.constant 0 : i32
    %c0_i32_0 = arith.constant 0 : i32
    return %arg0, %c0_i32 : i32, i32
  }
  func.func @transform_9(%arg0: i32) -> (i32, i32) {
    %c0_i32 = arith.constant 0 : i32
    %c0_i32_0 = arith.constant 0 : i32
    return %arg0, %c0_i32 : i32, i32
  }
}

module attributes {stable_mosaic.version = 11 : i64} {
  func.func @_attn_out_kernel(%arg0: i32, %arg1: i32, %arg2: memref<1x4x8x64xbf16, #tpu.memory_space<vmem>>, %arg3: memref<1x4x8x64xbf16, #tpu.memory_space<vmem>>, %arg4: memref<1x4x8x64xbf16, #tpu.memory_space<vmem>>, %arg5: memref<1x1x8x8xi8, #tpu.memory_space<vmem>>, %arg6: memref<1x8x512xf32, #tpu.memory_space<vmem>>, %arg7: memref<256x512xbf16, #tpu.memory_space<vmem>>, %arg8: memref<1x512xf32, #tpu.memory_space<vmem>>, %arg9: memref<1x512xf32, #tpu.memory_space<vmem>>, %arg10: memref<1x512xf32, #tpu.memory_space<vmem>>, %arg11: memref<1x8x512xf32, #tpu.memory_space<vmem>>, %arg12: memref<1x4x8x8xbf16, #tpu.memory_space<vmem>>, %arg13: memref<8x256xf32, #tpu.memory_space<vmem>>) attributes {dimension_semantics = [#tpu.dimension_semantics<parallel>, #tpu.dimension_semantics<parallel>], iteration_bounds = array<i64: 2, 1>, scalar_prefetch = 0 : i64, scratch_operands = 1 : i64, tpu.core_type = #tpu.core_type<tc>, window_params = [{transform_indices = @transform_0, window_bounds = array<i64: 1, 4, 8, 64>}, {transform_indices = @transform_1, window_bounds = array<i64: 1, 4, 8, 64>}, {transform_indices = @transform_2, window_bounds = array<i64: 1, 4, 8, 64>}, {transform_indices = @transform_3, window_bounds = array<i64: 1, 1, 8, 8>}, {transform_indices = @transform_4, window_bounds = array<i64: 1, 8, 512>}, {pipeline_mode = #tpu.pipeline_mode<synchronous>, transform_indices = @transform_5, window_bounds = array<i64: 256, 512>}, {pipeline_mode = #tpu.pipeline_mode<synchronous>, transform_indices = @transform_6, window_bounds = array<i64: 1, 512>}, {pipeline_mode = #tpu.pipeline_mode<synchronous>, transform_indices = @transform_7, window_bounds = array<i64: 1, 512>}, {pipeline_mode = #tpu.pipeline_mode<synchronous>, transform_indices = @transform_8, window_bounds = array<i64: 1, 512>}, {transform_indices = @transform_9, window_bounds = array<i64: 1, 8, 512>}, {transform_indices = @transform_10, window_bounds = array<i64: 1, 4, 8, 8>}]} {
    %c0 = arith.constant 0 : index
    %c0_0 = arith.constant 0 : index
    %c0_1 = arith.constant 0 : index
    %c0_2 = arith.constant 0 : index
    %0 = vector.load %arg2[%c0, %c0_0, %c0_1, %c0_2] : memref<1x4x8x64xbf16, #tpu.memory_space<vmem>>, vector<1x4x8x64xbf16>
    %1 = vector.shape_cast %0 : vector<1x4x8x64xbf16> to vector<4x8x64xbf16>
    %c0_3 = arith.constant 0 : index
    %c0_4 = arith.constant 0 : index
    %c0_5 = arith.constant 0 : index
    %c0_6 = arith.constant 0 : index
    %2 = vector.load %arg3[%c0_3, %c0_4, %c0_5, %c0_6] : memref<1x4x8x64xbf16, #tpu.memory_space<vmem>>, vector<1x4x8x64xbf16>
    %3 = vector.shape_cast %2 : vector<1x4x8x64xbf16> to vector<4x8x64xbf16>
    %c0_7 = arith.constant 0 : index
    %c0_8 = arith.constant 0 : index
    %c0_9 = arith.constant 0 : index
    %c0_10 = arith.constant 0 : index
    %4 = vector.load %arg4[%c0_7, %c0_8, %c0_9, %c0_10] : memref<1x4x8x64xbf16, #tpu.memory_space<vmem>>, vector<1x4x8x64xbf16>
    %5 = vector.shape_cast %4 : vector<1x4x8x64xbf16> to vector<4x8x64xbf16>
    %c0_11 = arith.constant 0 : index
    %c0_12 = arith.constant 0 : index
    %c0_13 = arith.constant 0 : index
    %c0_14 = arith.constant 0 : index
    %6 = vector.load %arg5[%c0_11, %c0_12, %c0_13, %c0_14] : memref<1x1x8x8xi8, #tpu.memory_space<vmem>>, vector<1x1x8x8xi8>
    %7 = vector.shape_cast %6 : vector<1x1x8x8xi8> to vector<8x8xi8>
    %c0_i8 = arith.constant 0 : i8
    %8 = vector.broadcast %c0_i8 : i8 to vector<8x8xi8>
    %9 = arith.cmpi ne, %7, %8 : vector<8x8xi8>
    "tpu.trace_start"() <{level = 10 : i32, message = "hqd,hkd->hqk"}> : () -> ()
    %cst = arith.constant dense<0.000000e+00> : vector<4x8x8xf32>
    %10 = tpu.matmul %1, %3, %cst {dimension_numbers = #tpu.dot_dimension_numbers<[2], [2], [1], [1], [0, 0, 0, 1, 1, 1], [0], [0]>} : vector<4x8x64xbf16>, vector<4x8x64xbf16>, vector<4x8x8xf32> -> vector<4x8x8xf32>
    "tpu.trace_stop"() : () -> ()
    %11 = vector.shape_cast %9 : vector<8x8xi1> to vector<1x8x8xi1>
    %cst_15 = arith.constant -1.000000e+09 : f32
    %12 = vector.shape_cast %11 : vector<1x8x8xi1> to vector<1x8x8xi1>
    %13 = vector.broadcast %12 : vector<1x8x8xi1> to vector<4x8x8xi1>
    %14 = vector.broadcast %cst_15 : f32 to vector<4x8x8xf32>
    %15 = arith.select %13, %14, %10 : vector<4x8x8xi1>, vector<4x8x8xf32>
    %cst_16 = arith.constant dense<0xFF800000> : vector<4x8xf32>
    %16 = vector.multi_reduction <maximumf>, %15, %cst_16 [2] : vector<4x8x8xf32> to vector<4x8xf32>
    %17 = vector.shape_cast %16 : vector<4x8xf32> to vector<4x8x1xf32>
    %18 = vector.broadcast %17 : vector<4x8x1xf32> to vector<4x8x8xf32>
    %19 = arith.subf %15, %18 : vector<4x8x8xf32>
    %20 = math.exp %19 : vector<4x8x8xf32>
    %cst_17 = arith.constant dense<0.000000e+00> : vector<4x8xf32>
    %21 = vector.multi_reduction <add>, %20, %cst_17 [2] : vector<4x8x8xf32> to vector<4x8xf32>
    %22 = vector.shape_cast %21 : vector<4x8xf32> to vector<4x8x1xf32>
    %23 = tpu.reciprocal %22 {approx = true} : vector<4x8x1xf32> -> vector<4x8x1xf32>
    %24 = vector.broadcast %23 : vector<4x8x1xf32> to vector<4x8x8xf32>
    %25 = arith.mulf %20, %24 : vector<4x8x8xf32>
    %26 = arith.truncf %25 : vector<4x8x8xf32> to vector<4x8x8xbf16>
    %c0_18 = arith.constant 0 : index
    %c0_19 = arith.constant 0 : index
    %c0_20 = arith.constant 0 : index
    %c0_21 = arith.constant 0 : index
    %27 = vector.load %arg12[%c0_18, %c0_19, %c0_20, %c0_21] : memref<1x4x8x8xbf16, #tpu.memory_space<vmem>>, vector<1x4x8x8xbf16>
    %28 = vector.shape_cast %27 : vector<1x4x8x8xbf16> to vector<4x8x8xbf16>
    %29 = vector.shape_cast %26 : vector<4x8x8xbf16> to vector<1x4x8x8xbf16>
    tpu.vector_store %arg12[%c0_18, %c0_19, %c0_20, %c0_21], %29 {strides = array<i32>} : memref<1x4x8x8xbf16, #tpu.memory_space<vmem>>, vector<1x4x8x8xbf16>,
    %30 = arith.truncf %25 : vector<4x8x8xf32> to vector<4x8x8xbf16>
    "tpu.trace_start"() <{level = 10 : i32, message = "hqk,hkd->hqd"}> : () -> ()
    %cst_22 = arith.constant dense<0.000000e+00> : vector<4x8x64xf32>
    %31 = tpu.matmul %30, %5, %cst_22 {dimension_numbers = #tpu.dot_dimension_numbers<[2], [1], [1], [2], [0, 0, 0, 1, 1, 2], [0], [0]>} : vector<4x8x8xbf16>, vector<4x8x64xbf16>, vector<4x8x64xf32> -> vector<4x8x64xf32>
    "tpu.trace_stop"() : () -> ()
    %32 = vector.extract_strided_slice %31 {offsets = [0, 0, 0], sizes = [1, 8, 64], strides = [1, 1, 1]} : vector<4x8x64xf32> to vector<1x8x64xf32>
    %33 = vector.shape_cast %32 : vector<1x8x64xf32> to vector<8x64xf32>
    %c0_23 = arith.constant 0 : index
    %c0_24 = arith.constant 0 : index
    %34 = vector.load %arg13[%c0_23, %c0_24] : memref<8x256xf32, #tpu.memory_space<vmem>>, vector<8x64xf32>
    tpu.vector_store %arg13[%c0_23, %c0_24], %33 {strides = array<i32>} : memref<8x256xf32, #tpu.memory_space<vmem>>, vector<8x64xf32>,
    %35 = vector.extract_strided_slice %31 {offsets = [1, 0, 0], sizes = [1, 8, 64], strides = [1, 1, 1]} : vector<4x8x64xf32> to vector<1x8x64xf32>
    %36 = vector.shape_cast %35 : vector<1x8x64xf32> to vector<8x64xf32>
    %c0_25 = arith.constant 0 : index
    %c64 = arith.constant 64 : index
    %37 = vector.load %arg13[%c0_25, %c64] : memref<8x256xf32, #tpu.memory_space<vmem>>, vector<8x64xf32>
    tpu.vector_store %arg13[%c0_25, %c64], %36 {strides = array<i32>} : memref<8x256xf32, #tpu.memory_space<vmem>>, vector<8x64xf32>,
    %38 = vector.extract_strided_slice %31 {offsets = [2, 0, 0], sizes = [1, 8, 64], strides = [1, 1, 1]} : vector<4x8x64xf32> to vector<1x8x64xf32>
    %39 = vector.shape_cast %38 : vector<1x8x64xf32> to vector<8x64xf32>
    %c0_26 = arith.constant 0 : index
    %c128 = arith.constant 128 : index
    %40 = vector.load %arg13[%c0_26, %c128] : memref<8x256xf32, #tpu.memory_space<vmem>>, vector<8x64xf32>
    tpu.vector_store %arg13[%c0_26, %c128], %39 {strides = array<i32>} : memref<8x256xf32, #tpu.memory_space<vmem>>, vector<8x64xf32>,
    %41 = vector.extract_strided_slice %31 {offsets = [3, 0, 0], sizes = [1, 8, 64], strides = [1, 1, 1]} : vector<4x8x64xf32> to vector<1x8x64xf32>
    %42 = vector.shape_cast %41 : vector<1x8x64xf32> to vector<8x64xf32>
    %c0_27 = arith.constant 0 : index
    %c192 = arith.constant 192 : index
    %43 = vector.load %arg13[%c0_27, %c192] : memref<8x256xf32, #tpu.memory_space<vmem>>, vector<8x64xf32>
    tpu.vector_store %arg13[%c0_27, %c192], %42 {strides = array<i32>} : memref<8x256xf32, #tpu.memory_space<vmem>>, vector<8x64xf32>,
    %c0_28 = arith.constant 0 : index
    %c0_29 = arith.constant 0 : index
    %c0_30 = arith.constant 0 : index
    %44 = vector.load %arg6[%c0_28, %c0_29, %c0_30] : memref<1x8x512xf32, #tpu.memory_space<vmem>>, vector<1x8x512xf32>
    %45 = vector.shape_cast %44 : vector<1x8x512xf32> to vector<8x512xf32>
    %c0_31 = arith.constant 0 : index
    %c0_32 = arith.constant 0 : index
    %46 = vector.load %arg8[%c0_31, %c0_32] : memref<1x512xf32, #tpu.memory_space<vmem>>, vector<1x512xf32>
    %47 = vector.broadcast %46 : vector<1x512xf32> to vector<8x512xf32>
    %48 = arith.addf %45, %47 : vector<8x512xf32>
    %c0_33 = arith.constant 0 : index
    %c0_34 = arith.constant 0 : index
    %49 = vector.load %arg13[%c0_33, %c0_34] : memref<8x256xf32, #tpu.memory_space<vmem>>, vector<8x256xf32>
    %50 = arith.truncf %49 : vector<8x256xf32> to vector<8x256xbf16>
    %c0_35 = arith.constant 0 : index
    %c0_36 = arith.constant 0 : index
    %51 = vector.load %arg7[%c0_35, %c0_36] : memref<256x512xbf16, #tpu.memory_space<vmem>>, vector<256x512xbf16>
    %cst_37 = arith.constant dense<0.000000e+00> : vector<8x512xf32>
    %52 = tpu.matmul %50, %51, %cst_37 {dimension_numbers = #tpu.dot_dimension_numbers<[1], [0], [0], [1], [0, 0, 1, 1], [], []>} : vector<8x256xbf16>, vector<256x512xbf16>, vector<8x512xf32> -> vector<8x512xf32>
    %53 = arith.addf %48, %52 : vector<8x512xf32>
    %cst_38 = arith.constant dense<0.000000e+00> : vector<8xf32>
    %54 = vector.multi_reduction <add>, %53, %cst_38 [1] : vector<8x512xf32> to vector<8xf32>
    %55 = vector.shape_cast %54 : vector<8xf32> to vector<8x1xf32>
    %cst_39 = arith.constant 5.120000e+02 : f32
    %56 = vector.broadcast %cst_39 : f32 to vector<8x1xf32>
    %57 = arith.divf %55, %56 : vector<8x1xf32>
    %58 = vector.broadcast %57 : vector<8x1xf32> to vector<8x512xf32>
    %59 = arith.subf %53, %58 : vector<8x512xf32>
    %60 = arith.mulf %59, %59 : vector<8x512xf32>
    %cst_40 = arith.constant dense<0.000000e+00> : vector<8xf32>
    %61 = vector.multi_reduction <add>, %60, %cst_40 [1] : vector<8x512xf32> to vector<8xf32>
    %62 = vector.shape_cast %61 : vector<8xf32> to vector<8x1xf32>
    %cst_41 = arith.constant 5.120000e+02 : f32
    %63 = vector.broadcast %cst_41 : f32 to vector<8x1xf32>
    %64 = arith.divf %62, %63 : vector<8x1xf32>
    %65 = vector.broadcast %57 : vector<8x1xf32> to vector<8x512xf32>
    %66 = arith.subf %53, %65 : vector<8x512xf32>
    %cst_42 = arith.constant 9.99999974E-6 : f32
    %67 = vector.broadcast %cst_42 : f32 to vector<8x1xf32>
    %68 = arith.addf %64, %67 : vector<8x1xf32>
    %69 = math.rsqrt %68 : vector<8x1xf32>
    %70 = vector.broadcast %69 : vector<8x1xf32> to vector<8x512xf32>
    %71 = arith.mulf %66, %70 : vector<8x512xf32>
    %c0_43 = arith.constant 0 : index
    %c0_44 = arith.constant 0 : index
    %72 = vector.load %arg9[%c0_43, %c0_44] : memref<1x512xf32, #tpu.memory_space<vmem>>, vector<1x512xf32>
    %73 = vector.broadcast %72 : vector<1x512xf32> to vector<8x512xf32>
    %74 = arith.mulf %71, %73 : vector<8x512xf32>
    %c0_45 = arith.constant 0 : index
    %c0_46 = arith.constant 0 : index
    %75 = vector.load %arg10[%c0_45, %c0_46] : memref<1x512xf32, #tpu.memory_space<vmem>>, vector<1x512xf32>
    %76 = vector.broadcast %75 : vector<1x512xf32> to vector<8x512xf32>
    %77 = arith.addf %74, %76 : vector<8x512xf32>
    %c0_47 = arith.constant 0 : index
    %c0_48 = arith.constant 0 : index
    %c0_49 = arith.constant 0 : index
    %78 = vector.load %arg11[%c0_47, %c0_48, %c0_49] : memref<1x8x512xf32, #tpu.memory_space<vmem>>, vector<1x8x512xf32>
    %79 = vector.shape_cast %78 : vector<1x8x512xf32> to vector<8x512xf32>
    %80 = vector.shape_cast %77 : vector<8x512xf32> to vector<1x8x512xf32>
    tpu.vector_store %arg11[%c0_47, %c0_48, %c0_49], %80 {strides = array<i32>} : memref<1x8x512xf32, #tpu.memory_space<vmem>>, vector<1x8x512xf32>,
    return
  }
  func.func @transform_0(%arg0: i32, %arg1: i32) -> (i32, i32, i32, i32) {
    %c0_i32 = arith.constant 0 : i32
    %c0_i32_0 = arith.constant 0 : i32
    %c0_i32_1 = arith.constant 0 : i32
    return %arg0, %c0_i32, %arg1, %c0_i32_0 : i32, i32, i32, i32
  }
  func.func @transform_1(%arg0: i32, %arg1: i32) -> (i32, i32, i32, i32) {
    %c0_i32 = arith.constant 0 : i32
    %c0_i32_0 = arith.constant 0 : i32
    %c0_i32_1 = arith.constant 0 : i32
    %c0_i32_2 = arith.constant 0 : i32
    return %arg0, %c0_i32, %c0_i32_0, %c0_i32_1 : i32, i32, i32, i32
  }
  func.func @transform_2(%arg0: i32, %arg1: i32) -> (i32, i32, i32, i32) {
    %c0_i32 = arith.constant 0 : i32
    %c0_i32_0 = arith.constant 0 : i32
    %c0_i32_1 = arith.constant 0 : i32
    %c0_i32_2 = arith.constant 0 : i32
    return %arg0, %c0_i32, %c0_i32_0, %c0_i32_1 : i32, i32, i32, i32
  }
  func.func @transform_3(%arg0: i32, %arg1: i32) -> (i32, i32, i32, i32) {
    %c0_i32 = arith.constant 0 : i32
    %c0_i32_0 = arith.constant 0 : i32
    %c0_i32_1 = arith.constant 0 : i32
    return %arg0, %c0_i32, %arg1, %c0_i32_0 : i32, i32, i32, i32
  }
  func.func @transform_4(%arg0: i32, %arg1: i32) -> (i32, i32, i32) {
    %c0_i32 = arith.constant 0 : i32
    %c0_i32_0 = arith.constant 0 : i32
    return %arg0, %arg1, %c0_i32 : i32, i32, i32
  }
  func.func @transform_5(%arg0: i32, %arg1: i32) -> (i32, i32) {
    %c0_i32 = arith.constant 0 : i32
    %c0_i32_0 = arith.constant 0 : i32
    %c0_i32_1 = arith.constant 0 : i32
    return %c0_i32, %c0_i32_0 : i32, i32
  }
  func.func @transform_6(%arg0: i32, %arg1: i32) -> (i32, i32) {
    %c0_i32 = arith.constant 0 : i32
    %c0_i32_0 = arith.constant 0 : i32
    %c0_i32_1 = arith.constant 0 : i32
    return %c0_i32, %c0_i32_0 : i32, i32
  }
  func.func @transform_7(%arg0: i32, %arg1: i32) -> (i32, i32) {
    %c0_i32 = arith.constant 0 : i32
    %c0_i32_0 = arith.constant 0 : i32
    %c0_i32_1 = arith.constant 0 : i32
    return %c0_i32, %c0_i32_0 : i32, i32
  }
  func.func @transform_8(%arg0: i32, %arg1: i32) -> (i32, i32) {
    %c0_i32 = arith.constant 0 : i32
    %c0_i32_0 = arith.constant 0 : i32
    %c0_i32_1 = arith.constant 0 : i32
    return %c0_i32, %c0_i32_0 : i32, i32
  }
  func.func @transform_9(%arg0: i32, %arg1: i32) -> (i32, i32, i32) {
    %c0_i32 = arith.constant 0 : i32
    %c0_i32_0 = arith.constant 0 : i32
    return %arg0, %arg1, %c0_i32 : i32, i32, i32
  }
  func.func @transform_10(%arg0: i32, %arg1: i32) -> (i32, i32, i32, i32) {
    %c0_i32 = arith.constant 0 : i32
    %c0_i32_0 = arith.constant 0 : i32
    %c0_i32_1 = arith.constant 0 : i32
    return %arg0, %c0_i32, %arg1, %c0_i32_0 : i32, i32, i32, i32
  }
}

</mosaic_0001>

<bundles_post_ra>
// kernel: multi_head_attention.3
= control target key start
LH: loop header
LB: loop body
LE: loop exit
PB: predicated region body
PF: predicated region fallthrough
CT: control target
= control target key end

     0   :  { %s2735_s0 = inlined_call_operand.vmem [shape: bf16[2,4,8,64], index: 0, kind: input, shape index: {}]   ;;  %s2736_s1 = inlined_call_operand.vmem [shape: bf16[2,4,8,64], index: 1, kind: input, shape index: {}]   ;;  %s2737_s2 = inlined_call_operand.vmem [shape: bf16[2,4,8,64], index: 2, kind: input, shape index: {}]   ;;  %s2738_s3 = inlined_call_operand.vmem [shape: s8[2,1,8,8], index: 3, kind: input, shape index: {}]   ;;  %s2739_s4 = inlined_call_operand.vmem [shape: f32[2,8,512], index: 4, kind: input, shape index: {}]   ;;  %s2740_s5 = inlined_call_operand.vmem [shape: bf16[256,512], index: 5, kind: input, shape index: {}]   ;;  %s2741_s6 = inlined_call_operand.vmem [shape: f32[1,512], index: 6, kind: input, shape index: {}]   ;;  %s2742_s7 = inlined_call_operand.vmem [shape: f32[1,512], index: 7, kind: input, shape index: {}]   ;;  %s2743_s8 = inlined_call_operand.vmem [shape: f32[1,512], index: 8, kind: input, shape index: {}]   ;;  %s2744_s9 = inlined_call_operand.hbm [shape: f32[2,8,512], index: 9, kind: output, shape index: {0}]   ;;  %s2745_s10 = inlined_call_operand.hbm [shape: bf16[2,4,8,8], index: 10, kind: output, shape index: {1}]  }
   0x1   :  { %2746 = sst [smem:[#allocation9_spill]] %s2735_s0 }
   0x2   :  { %2747 = sst [smem:[#allocation10_spill]] %s2736_s1 }
   0x3   :  { %2748 = sst [smem:[#allocation11_spill]] %s2737_s2 }
   0x4   :  { %2749 = sst [smem:[#allocation12_spill]] %s2738_s3 }
   0x5   :  { %16 = vsyncpa [#allocation4], 0 }
   0x6   :  { %18 = vsyncpa [#allocation4 + $0x1], 0 }
   0x7   :  { %19 = vsyncpa [#allocation6], 0 }
   0x8   :  { %21 = vsyncpa [#allocation6 + $0x1], 0  ;;  %s2272_s13 = smov 0   ;;  %s2274_s14 = smov 0  }
   0x9   :  { %s2276_s15 = smov 0   ;;  %s2278_s16 = smov 0  }
   0xa   :  { %s2280_s17 = smov 0   ;;  %s2282_s18 = smov 0  }
   0xb LB: > { %s1757_s19 = sadd.s32 4294967295, %s2208_s18   ;;  %s1758_s20 = sadd.s32 4294967294, %s2208_s18   ;;  %s2208_s18 = sphi %s2282_s18, %s27_s18   ;;  %s2204_s17 = sphi %s2280_s17, %s2762_s17   ;;  %s2200_s16 = sphi %s2278_s16, %s2761_s16   ;;  %s2196_s15 = sphi %s2276_s15, %s2760_s15   ;;  %s2192_s14 = sphi %s2274_s14, %s2759_s14   ;;  %s2188_s13 = sphi %s2272_s13, %s2758_s13  }
   0xc   : > { %s39_s21 = sadd.s32 1, %s2204_s17  ;;  %s268_s22 = sadd.s32 1, %s2196_s15 }
   0xd   : > { %p41_p0 = scmp.ge.s32.totalorder %s39_s21, 2  ;;  %p278_p1 = scmp.ne.s32.totalorder %s2196_s15, %s2192_s14 }
   0xe   : > { %p279_p2 = scmp.eq.s32.totalorder %s1757_s19, 1  ;;  %p284_p3 = scmp.ne.s32.totalorder %s2192_s14, %s2188_s13 }
   0xf   : > { %s2764_s21 = smov (%p41_p0, %s39_s21), 0  ;;  %p285_p5 = scmp.eq.s32.totalorder %s1758_s20, 1 }
  0x10   : > { %p2312_p4 = por %p279_p2, %p278_p1  ;;  %s263_s24 = ssub.s32 %s2204_s17, %s2764_s21 }
  0x11   : > { %p1761_p6 = scmp.ge.s32.totalorder %s2208_s18, 1  ;;  %p266_p7 = scmp.eq.s32.totalorder %s263_s24, 0 }
  0x12   : > { %p2319_p8 = por %p285_p5, %p284_p3  ;;  %p392_p9 = scmp.lt.s32.totalorder %s2208_s18, 3 }
  0x13   : > { %s2325_s26 = scalar_select %p266_p7, %s2196_s15, %s268_s22  }
  0x14   : > { %p393_p10 = pnand %p1761_p6, %p392_p9 }
  0x15   : > { %p464_p11 = scmp.lt.s32.totalorder (!%p393_p10), %s2200_s16, 1  ;;  %s2752_s1 = sld [smem:[#allocation10_spill]] (!%p393_p10) }
  0x16   : > { %396 = sbr.rel (%p393_p10) target bundleno = 1404 (0x57c), region = 56  ;;  %s2753_s0 = sld [smem:[#allocation9_spill]] (!%p393_p10) }
  0x17   : > { %s2754_s3 = sld [smem:[#allocation12_spill]] (!%p393_p10)  ;;  %s2213_s12 = smov (!%p393_p10), 64  }
  0x18   : > { %s2757_s2 = sld [smem:[#allocation11_spill]] (!%p393_p10) }
  0x1b   : > { %v2210_v0 = vmov 0.0   ;;  %s2331_s27 = scalar_select %p464_p11, %s2200_s16, 1  ;;  %vm2211_vm0 = vmmov 0   ;;  %vm515_vm1 = vcmask 523264   ;;  %v2212_v14 = vmov 0  }
  0x1c   : > { %1875 = vmatprep.subr.bf16.mxu0 %v2210_v0  ;;  %1881 = vmatprep.subr.bf16.mxu1 %v2210_v0  ;;  %vm709_vm4 = vcmask 64512   ;;  %vm766_vm5 = vcmask 1043456   ;;  %vm758_vm6 = vcmask 60416   ;;  %vm953_vm7 = vcmask 1048064  }
  0x1d   : > { %1877 = vmatprep.mubr.msk.bf16.mxu0 %vm2211_vm0, %v2210_v0  ;;  %1883 = vmatprep.mubr.msk.bf16.mxu1 %vm2211_vm0, %v2210_v0  ;;  %s2338_s28 = sshll.u32 %s2331_s27, 4  ;;  %s1770_s22 = sshll.u32 %s2331_s27, 1 }
  0x1e   : > { %s476_s11 = scalar_lea.vmem %s2752_s1, %s2338_s28  ;;  %s471_s20 = scalar_lea.vmem %s2753_s0, %s2338_s28 }
  0x1f   : > { %v505_v1 = vld [vmem:[%s476_s11] sm:$0xf]  ;;  %v506_v2 = vld [vmem:[%s476_s11 + $0x4] sm:$0xf]  ;;  %v507_v5 = vld [vmem:[%s476_s11 + $0x8] sm:$0xf]  ;;  %s488_s30 = scalar_lea.vmem %s2754_s3, %s1770_s22  ;;  %s481_s19 = scalar_lea.vmem %s2757_s2, %s2338_s28 }
  0x20   : > { %v520_v3 = vsel %vm515_vm1, %v505_v1, 0  ;;  %v566_v4 = vsel %vm515_vm1, %v506_v2, 0  ;;  %v508_v6 = vld [vmem:[%s476_s11 + $0xc] sm:$0xf]  ;;  %v501_v7 = vld [vmem:[%s471_s20] sm:$0xf] }
  0x21   : > { %1876 = vmatpush3.bf16.xpose.msra.mxu0 %v520_v3  ;;  %1882 = vmatpush3.bf16.xpose.msra.mxu1 %v566_v4  ;;  %v502_v8 = vld [vmem:[%s471_s20 + $0x4] sm:$0xf]  ;;  %v612_v9 = vsel %vm515_vm1, %v507_v5, 0  ;;  %v658_v10 = vsel %vm515_vm1, %v508_v6, 0  ;;  %v503_v11 = vld [vmem:[%s471_s20 + $0x8] sm:$0xf] }
  0x22   : > { %1887 = vmatprep.subr.bf16.mxu0 %v2210_v0  ;;  %1893 = vmatprep.subr.bf16.mxu1 %v2210_v0  ;;  %v504_v12 = vld [vmem:[%s471_s20 + $0xc] sm:$0xf]  ;;  %v513_v13 = vld [vmem:[%s488_s30] sm:$0x3]  ;;  %v510_v62 = vld [vmem:[%s481_s19 + $0x4] sm:$0xf] }
  0x23   : > { %vm514_vm2 = vnez %v513_v13  ;;  %v814_v63 = vsel %vm766_vm5, %v510_v62, 0  ;;  %v509_v1 = vld [vmem:[%s481_s19] sm:$0xf]  ;;  %v512_v2 = vld [vmem:[%s481_s19 + $0xc] sm:$0xf]  ;;  %s2399_s28 = sand.u32 1, %s2192_s14  }
  0x24   : > { %v700_v15 = vsel %vm514_vm2, 16843009, %v2212_v14  ;;  %v768_v3 = vsel %vm766_vm5, %v509_v1, 0  ;;  %v906_v4 = vsel %vm766_vm5, %v512_v2, 0  ;;  %v511_v5 = vld [vmem:[%s481_s19 + $0x8] sm:$0xf] }
  0x25   : > { %v701_v16 = vunpack.c.0.s8 %v700_v15  ;;  %v860_v6 = vsel %vm766_vm5, %v511_v5, 0  ;;  %s1763_s20 = sshll.u32 %s2399_s28, 4  ;;  %v2050_v62 = vld [vmem:[%s2740_s5 + $0x1a4] ss:$16 sps:$4 sm:$0xff]   ;;  %v2048_v1 = vld [vmem:[%s2740_s5 + $0x1a0] ss:$16 sps:$4 sm:$0xff]  }
  0x26   : > { %s2403_s22 = scalar_lea.vmem [#allocation5], %s1763_s20  ;;  %v2051_v2 = vld [vmem:[%s2740_s5 + $0x1a8] ss:$16 sps:$4 sm:$0xff]   ;;  %v2054_v5 = vld [vmem:[%s2740_s5 + $0x180] ss:$16 sps:$4 sm:$0xff]   ;;  %s1856_s3 = sshll.u32 %s2331_s27, 5 }
  0x27   : > { %vm2372_vm3 = vcmp.ne.s32.totalorder %v701_v16, 0  ;;  %s497_s30 = scalar_lea.vmem %s2739_s4, %s1856_s3  ;;  %s1858_s27 = sshll.u32 %s2200_s16, 8 }
  0x28   : > { %1878 = vmatmul.mubr.msk.bf16.vlgmr.msra.gmra.mxu0 %vm515_vm1, %v501_v7  ;;  %1884 = vmatmul.mubr.msk.bf16.vlgmr.msra.gmra.mxu1 %vm515_vm1, %v502_v8  ;;  %s1584_s11 = sshll.u32 %s2403_s22, 4  ;;  %s2640_s2 = scalar_lea.hbm %s2745_s10, %s1858_s27  ;;  %s2642_s11 = int_to_ptr.vmem [resolvable:$true] %s1584_s11 }
  0x29   : > { %1888 = vmatpush3.bf16.xpose.msra.mxu0 %v612_v9  ;;  %1894 = vmatpush3.bf16.xpose.msra.mxu1 %v658_v10  ;;  %s1554_s3 = scalar_lea.sflag [#allocation6], %s2399_s28  ;;  %s2102_s19 = scalar_lea.vmem %s2642_s11, 256 }
  0x2a   : > { %1889 = vmatprep.mubr.msk.bf16.mxu0 %vm2211_vm0, %v2210_v0  ;;  %1895 = vmatprep.mubr.msk.bf16.mxu1 %vm2211_vm0, %v2210_v0  ;;  %p2103_p12 = scmp.ne.s32.totalorder %s2642_s11, %s2102_s19  ;;  %s2214_s20 = smov [#allocation5]  }
  0x2b   : > { %1905 = vmatprep.subr.bf16.mxu1 %v2210_v0  ;;  %1899 = vmatprep.subr.bf16.mxu0 %v2210_v0  ;;  %s2106_s24 = sshll.u32 %s2214_s20, 4  ;;  %s2107_s24 = int_to_ptr.vmem [resolvable:$false] %s2106_s24 }
  0x2c   : > { %p2104_p13 = pnand %p2103_p12, %p2312_p4  ;;  %p2109_p1 = scmp.lt.s32.totalorder %s2642_s11, %s2107_s24 }
  0x2e   : > { %p2105_p0 = pneg %p2104_p13 }
  0x30   : > { %1890 = vmatmul.mubr.msk.bf16.vlgmr.msra.gmra.mxu0 %vm515_vm1, %v503_v11  ;;  %1896 = vmatmul.mubr.msk.bf16.vlgmr.msra.gmra.mxu1 %vm515_vm1, %v504_v12 }
  0x31   : > { %1907 = vmatprep.mubr.msk.bf16.mxu1 %vm2211_vm0, %v2210_v0  ;;  %1901 = vmatprep.mubr.msk.bf16.mxu0 %vm2211_vm0, %v2210_v0 }
  0x32   : > { %1906 = vmatpush3.bf16.msra.mxu1 %v814_v63  ;;  %1900 = vmatpush3.bf16.msra.mxu0 %v768_v3  ;;  %v2053_v63 = vld [vmem:[%s2740_s5 + $0x1ac] ss:$16 sps:$4 sm:$0xff]   ;;  %v2056_v3 = vld [vmem:[%s2740_s5 + $0x184] ss:$16 sps:$4 sm:$0xff]  }
  0x33   : > { %1917 = vmatprep.subr.bf16.mxu1 %v2210_v0  ;;  %1911 = vmatprep.subr.bf16.mxu0 %v2210_v0 }
  0xe8   : > { %v556_v18 = vpop.f32.mrf.mxu0  ;;  %v602_v19 = vpop.f32.mrf.mxu1 }
  0xe9   : > { %v705_v20 = vsel %vm2372_vm3, -1e+09, %v556_v18  ;;  %v706_v21 = vsel %vm2372_vm3, -1e+09, %v602_v19 }
  0xea   : > { %v1879_v22 = vpop.f32.mrf.mxu0  ;;  %v1885_v23 = vpop.f32.mrf.mxu1  ;;  %v713_v24 = vsel %vm709_vm4, %v706_v21, -inf  ;;  %v710_v25 = vsel %vm709_vm4, %v705_v20, -inf }
  0xeb   : > { %714 = vmax.xlane.f32.xlu0 %v713_v24  ;;  %711 = vmax.xlane.f32.xlu1 %v710_v25  ;;  %v1988_v23 = vld [vmem:[%s2740_s5 + $0xe0] ss:$16 sps:$4 sm:$0xff]   ;;  %v1991_v24 = vld [vmem:[%s2740_s5 + $0xe8] ss:$16 sps:$4 sm:$0xff]   ;;  %v1993_v25 = vld [vmem:[%s2740_s5 + $0xec] ss:$16 sps:$4 sm:$0xff]  }
  0xec   : > { %v559_v26 = vpop.f32.mrf.mxu0  ;;  %v605_v27 = vpop.f32.mrf.mxu1 }
  0xed   : > { %v1996_v26 = vld [vmem:[%s2740_s5 + $0xc4] ss:$16 sps:$4 sm:$0xff]   ;;  %v1999_v27 = vld [vmem:[%s2740_s5 + $0xcc] ss:$16 sps:$4 sm:$0xff]  }
  0xee   : > { %v1880_v28 = vpop.f32.mrf.mxu0  ;;  %v1886_v29 = vpop.f32.mrf.mxu1 }
  0xef   : > { %v1994_v28 = vld [vmem:[%s2740_s5 + $0xc0] ss:$16 sps:$4 sm:$0xff]   ;;  %v1997_v29 = vld [vmem:[%s2740_s5 + $0xc8] ss:$16 sps:$4 sm:$0xff]  }
  0xf0   : > { %v648_v30 = vpop.f32.mrf.mxu0  ;;  %v694_v31 = vpop.f32.mrf.mxu1 }
  0xf1   : > { %v707_v32 = vsel %vm2372_vm3, -1e+09, %v648_v30  ;;  %v708_v33 = vsel %vm2372_vm3, -1e+09, %v694_v31  ;;  %v2002_v30 = vld [vmem:[%s2740_s5 + $0xa4] ss:$16 sps:$4 sm:$0xff]  }
  0xf2   : > { %v1897_v34 = vpop.f32.mrf.mxu1  ;;  %v719_v35 = vsel %vm709_vm4, %v708_v33, -inf  ;;  %v716_v36 = vsel %vm709_vm4, %v707_v32, -inf  ;;  %v1891_v37 = vpop.f32.mrf.mxu0  ;;  %v2005_v31 = vld [vmem:[%s2740_s5 + $0xac] ss:$16 sps:$4 sm:$0xff]  }
  0xf3   : > { %720 = vmax.xlane.f32.xlu0 %v719_v35  ;;  %717 = vmax.xlane.f32.xlu1 %v716_v36  ;;  %v2008_v34 = vld [vmem:[%s2740_s5 + $0x84] ss:$16 sps:$4 sm:$0xff]   ;;  %v2011_v35 = vld [vmem:[%s2740_s5 + $0x8c] ss:$16 sps:$4 sm:$0xff]   ;;  %v2006_v36 = vld [vmem:[%s2740_s5 + $0x80] ss:$16 sps:$4 sm:$0xff]  }
  0xf4   : > { %v697_v38 = vpop.f32.mrf.mxu1  ;;  %v651_v39 = vpop.f32.mrf.mxu0  ;;  %v2009_v37 = vld [vmem:[%s2740_s5 + $0x88] ss:$16 sps:$4 sm:$0xff]  }
  0xf5   : > { %v2014_v38 = vld [vmem:[%s2740_s5 + $0x64] ss:$16 sps:$4 sm:$0xff]   ;;  %v2017_v39 = vld [vmem:[%s2740_s5 + $0x6c] ss:$16 sps:$4 sm:$0xff]  }
  0xf6   : > { %v1898_v40 = vpop.f32.mrf.mxu1  ;;  %v1892_v41 = vpop.f32.mrf.mxu0 }
  0xf7   : > { %v2012_v40 = vld [vmem:[%s2740_s5 + $0x60] ss:$16 sps:$4 sm:$0xff]   ;;  %v2015_v41 = vld [vmem:[%s2740_s5 + $0x68] ss:$16 sps:$4 sm:$0xff]  }
 0x174   : > { %v715_v42 = vpop.xlane.xlu0 %714  ;;  %v712_v43 = vpop.xlane.xlu1 %711 }
 0x175   : > { %v723_v44 = vsub.f32 %v706_v21, %v715_v42  ;;  %v722_v45 = vsub.f32 %v705_v20, %v712_v43  ;;  %v2020_v42 = vld [vmem:[%s2740_s5 + $0x44] ss:$16 sps:$4 sm:$0xff]   ;;  %v2023_v43 = vld [vmem:[%s2740_s5 + $0x4c] ss:$16 sps:$4 sm:$0xff]  }
 0x177   : > { %v728_v46 = vmul.f32 1.442695, %v723_v44  ;;  %v726_v47 = vmul.f32 1.442695, %v722_v45  ;;  %v2018_v44 = vld [vmem:[%s2740_s5 + $0x40] ss:$16 sps:$4 sm:$0xff]  }
 0x178   : > { %v2021_v45 = vld [vmem:[%s2740_s5 + $0x48] ss:$16 sps:$4 sm:$0xff]  }
 0x179   : > { %2084 = vpow2.f32 %v728_v46  ;;  %v2026_v46 = vld [vmem:[%s2740_s5 + $0x24] ss:$16 sps:$4 sm:$0xff]  }
 0x17a   : > { %2086 = vpow2.f32 %v726_v47  ;;  %v2029_v47 = vld [vmem:[%s2740_s5 + $0x2c] ss:$16 sps:$4 sm:$0xff]  }
 0x17c   : > { %v721_v48 = vpop.xlane.xlu0 %720  ;;  %v718_v49 = vpop.xlane.xlu1 %717 }
 0x17d   : > { %v725_v50 = vsub.f32 %v708_v33, %v721_v48  ;;  %v724_v51 = vsub.f32 %v707_v32, %v718_v49  ;;  %v2000_v32 = vld [vmem:[%s2740_s5 + $0xa0] ss:$16 sps:$4 sm:$0xff]   ;;  %v2003_v33 = vld [vmem:[%s2740_s5 + $0xa8] ss:$16 sps:$4 sm:$0xff]  }
 0x17e   : > { %v2024_v48 = vld [vmem:[%s2740_s5 + $0x20] ss:$16 sps:$4 sm:$0xff]   ;;  %v2027_v49 = vld [vmem:[%s2740_s5 + $0x28] ss:$16 sps:$4 sm:$0xff]  }
 0x17f   : > { %v732_v52 = vmul.f32 1.442695, %v725_v50  ;;  %v730_v53 = vmul.f32 1.442695, %v724_v51  ;;  %v2032_v50 = vld [vmem:[%s2740_s5 + $0x4] ss:$16 sps:$4 sm:$0xff]  }
 0x180   : > { %v2035_v51 = vld [vmem:[%s2740_s5 + $0xc] ss:$16 sps:$4 sm:$0xff]  }
 0x181   : > { %2088 = vpow2.f32 %v732_v52  ;;  %v2030_v52 = vld [vmem:[%s2740_s5] ss:$16 sps:$4 sm:$0xff]  }
 0x182   : > { %2090 = vpow2.f32 %v730_v53  ;;  %v2033_v53 = vld [vmem:[%s2740_s5 + $0x8] ss:$16 sps:$4 sm:$0xff]  }
 0x186   : > { %v2085_v54 = vpop.eup %2084 }
 0x187   : > { %v737_v55 = vsel %vm709_vm4, %v2085_v54, 0.0  ;;  %v2087_v56 = vpop.eup %2086 }
 0x188   : > { %738 = vadd.xlane.f32.xlu0 %v737_v55  ;;  %v734_v57 = vsel %vm709_vm4, %v2087_v56, 0.0  ;;  %v2041_v55 = vld [vmem:[%s2740_s5 + $0x1ec] ss:$16 sps:$4 sm:$0xff]  }
 0x18c   : > { %735 = vadd.xlane.f32.xlu0 %v734_v57  ;;  %v2039_v57 = vld [vmem:[%s2740_s5 + $0x1e8] ss:$16 sps:$4 sm:$0xff]  }
 0x18e   : > { %v2089_v58 = vpop.eup %2088 }
 0x18f   : > { %v743_v59 = vsel %vm709_vm4, %v2089_v58, 0.0  ;;  %v2091_v60 = vpop.eup %2090 }
 0x190   : > { %744 = vadd.xlane.f32.xlu1 %v743_v59  ;;  %v740_v61 = vsel %vm709_vm4, %v2091_v60, 0.0  ;;  %v2047_v59 = vld [vmem:[%s2740_s5 + $0x1cc] ss:$16 sps:$4 sm:$0xff]  }
 0x194   : > { %741 = vadd.xlane.f32.xlu1 %v740_v61  ;;  %v2045_v61 = vld [vmem:[%s2740_s5 + $0x1c8] ss:$16 sps:$4 sm:$0xff]  }
 0x211   : > { %v739_v7 = vpop.xlane.xlu0 %738 }
 0x212   : > { %2092 = vrcp.f32 %v739_v7  ;;  %v2060_v7 = vld [vmem:[%s2740_s5 + $0x160] ss:$16 sps:$4 sm:$0xff]  }
 0x215   : > { %v736_v8 = vpop.xlane.xlu0 %735 }
 0x216   : > { %2094 = vrcp.f32 %v736_v8  ;;  %v2062_v8 = vld [vmem:[%s2740_s5 + $0x164] ss:$16 sps:$4 sm:$0xff]  }
 0x219   : > { %v745_v9 = vpop.xlane.xlu1 %744 }
 0x21a   : > { %2096 = vrcp.f32 %v745_v9  ;;  %v2063_v9 = vld [vmem:[%s2740_s5 + $0x168] ss:$16 sps:$4 sm:$0xff]  }
 0x21d   : > { %v742_v10 = vpop.xlane.xlu1 %741 }
 0x21e   : > { %2098 = vrcp.f32 %v742_v10  ;;  %v2065_v10 = vld [vmem:[%s2740_s5 + $0x16c] ss:$16 sps:$4 sm:$0xff]  }
 0x21f   : > { %v2093_v11 = vpop.eup %2092 }
 0x220   : > { %v751_v12 = vmul.f32 %v2093_v11, %v2085_v54  ;;  %v2038_v54 = vld [vmem:[%s2740_s5 + $0x1e4] ss:$16 sps:$4 sm:$0xff]   ;;  %v2068_v11 = vld [vmem:[%s2740_s5 + $0x14c] ss:$16 sps:$4 sm:$0xff]  }
 0x222   : > { %v755_v13 = vpack.c.bf16 %v751_v12, %v751_v12  ;;  %v2066_v12 = vld [vmem:[%s2740_s5 + $0x148] ss:$16 sps:$4 sm:$0xff]  }
 0x223   : > { %v2095_v14 = vpop.eup %2094 }
 0x224   : > { %1908 = vmatmul.mubr.msk.bf16.vlgmr.msra.gmra.mxu1 %vm709_vm4, %v755_v13  ;;  %v750_v15 = vmul.f32 %v2095_v14, %v2087_v56  ;;  %760 = vst.msk [vmem:[%s2403_s22 + $0x4] sm:$0xf] %vm758_vm6, %v755_v13  ;;  %v2036_v56 = vld [vmem:[%s2740_s5 + $0x1e0] ss:$16 sps:$4 sm:$0xff]   ;;  %v2071_v13 = vld [vmem:[%s2740_s5 + $0x144] ss:$16 sps:$4 sm:$0xff]  }
 0x225   : > { %1918 = vmatpush3.bf16.msra.mxu1 %v906_v4  ;;  %1919 = vmatprep.mubr.msk.bf16.mxu1 %vm2211_vm0, %v2210_v0  ;;  %v2059_v4 = vld [vmem:[%s2740_s5 + $0x18c] ss:$16 sps:$4 sm:$0xff]   ;;  %v2069_v14 = vld [vmem:[%s2740_s5 + $0x140] ss:$16 sps:$4 sm:$0xff]  }
 0x226   : > { %v754_v16 = vpack.c.bf16 %v750_v15, %v750_v15  ;;  %1420 = vmatprep.subr.bf16.mxu1 %v1993_v25  ;;  %v2074_v15 = vld [vmem:[%s2740_s5 + $0x124] ss:$16 sps:$4 sm:$0xff]  }
 0x227   : > { %v2097_v17 = vpop.eup %2096 }
 0x228   : > { %1902 = vmatmul.mubr.msk.bf16.vlgmr.msra.gmra.mxu0 %vm709_vm4, %v754_v16  ;;  %v753_v18 = vmul.f32 %v2097_v17, %v2089_v58  ;;  %759 = vst.msk [vmem:[%s2403_s22] sm:$0xf] %vm758_vm6, %v754_v16  ;;  %v2044_v58 = vld [vmem:[%s2740_s5 + $0x1c4] ss:$16 sps:$4 sm:$0xff]   ;;  %v2075_v16 = vld [vmem:[%s2740_s5 + $0x128] ss:$16 sps:$4 sm:$0xff]  }
 0x229   : > { %1912 = vmatpush3.bf16.msra.mxu0 %v860_v6  ;;  %1913 = vmatprep.mubr.msk.bf16.mxu0 %vm2211_vm0, %v2210_v0  ;;  %v1990_v0 = vld [vmem:[%s2740_s5 + $0xe4] ss:$16 sps:$4 sm:$0xff]   ;;  %v2057_v6 = vld [vmem:[%s2740_s5 + $0x188] ss:$16 sps:$4 sm:$0xff]   ;;  %v2072_v17 = vld [vmem:[%s2740_s5 + $0x120] ss:$16 sps:$4 sm:$0xff]  }
 0x22a   : > { %v757_v19 = vpack.c.bf16 %v753_v18, %v753_v18  ;;  %1379 = vmatprep.subr.bf16.mxu0 %v1990_v0  ;;  %v2077_v18 = vld [vmem:[%s2740_s5 + $0x12c] ss:$16 sps:$4 sm:$0xff]  }
 0x22b   : > { %v2099_v20 = vpop.eup %2098 }
 0x22c   : > { %1920 = vmatmul.mubr.msk.bf16.vlgmr.msra.gmra.mxu1 %vm709_vm4, %v757_v19  ;;  %v752_v21 = vmul.f32 %v2099_v20, %v2091_v60  ;;  %762 = vst.msk [vmem:[%s2403_s22 + $0xc] sm:$0xf] %vm758_vm6, %v757_v19  ;;  %v2042_v60 = vld [vmem:[%s2740_s5 + $0x1c0] ss:$16 sps:$4 sm:$0xff]   ;;  %v2080_v19 = vld [vmem:[%s2740_s5 + $0x104] ss:$16 sps:$4 sm:$0xff]  }
 0x22d   : > { %1421 = vmatpush1.bf16.msra.mxu1 %v1991_v24  ;;  %v2083_v20 = vld [vmem:[%s2740_s5 + $0x10c] ss:$16 sps:$4 sm:$0xff]  }
 0x22e   : > { %v756_v22 = vpack.c.bf16 %v752_v21, %v752_v21  ;;  %1422 = vmatprep.subr.bf16.mxu1 %v1999_v27 }
 0x230   : > { %1914 = vmatmul.mubr.msk.bf16.vlgmr.msra.gmra.mxu0 %vm709_vm4, %v756_v22  ;;  %761 = vst.msk [vmem:[%s2403_s22 + $0x8] sm:$0xf] %vm758_vm6, %v756_v22  ;;  %v2081_v22 = vld [vmem:[%s2740_s5 + $0x108] ss:$16 sps:$4 sm:$0xff]   ;;  %s2108_s22 = scalar_lea.vmem %s2107_s24, 512 }
 0x231   : > { %1380 = vmatpush1.bf16.msra.mxu0 %v1988_v23  ;;  %1423 = vmatpush1.bf16.msra.mxu1 %v1997_v29  ;;  %v2078_v23 = vld [vmem:[%s2740_s5 + $0x100] ss:$16 sps:$4 sm:$0xff]   ;;  %p2110_p2 = scmp.lt.s32.totalorder %s2108_s22, %s2102_s19 }
 0x232   : > { %1381 = vmatprep.subr.bf16.mxu0 %v1996_v26  ;;  %1424 = vmatprep.subr.bf16.mxu1 %v2005_v31 }
 0x233   : > { %p2111_p3 = por %p2110_p2, %p2109_p1 }
 0x235   : > { %1382 = vmatpush1.bf16.msra.mxu0 %v1994_v28  ;;  %1425 = vmatpush1.bf16.msra.mxu1 %v2003_v33  ;;  %p2112_p5 = pnand %p2111_p3, %p2105_p0 }
 0x236   : > { %1383 = vmatprep.subr.bf16.mxu0 %v2002_v30  ;;  %1426 = vmatprep.subr.bf16.mxu1 %v2011_v35 }
 0x239   : > { %1384 = vmatpush1.bf16.msra.mxu0 %v2000_v32  ;;  %1427 = vmatpush1.bf16.msra.mxu1 %v2009_v37 }
 0x23a   : > { %1385 = vmatprep.subr.bf16.mxu0 %v2008_v34  ;;  %1428 = vmatprep.subr.bf16.mxu1 %v2017_v39 }
 0x23d   : > { %1386 = vmatpush1.bf16.msra.mxu0 %v2006_v36  ;;  %1429 = vmatpush1.bf16.msra.mxu1 %v2015_v41 }
 0x23e   : > { %1387 = vmatprep.subr.bf16.mxu0 %v2014_v38  ;;  %1430 = vmatprep.subr.bf16.mxu1 %v2023_v43 }
 0x241   : > { %1388 = vmatpush1.bf16.msra.mxu0 %v2012_v40  ;;  %1431 = vmatpush1.bf16.msra.mxu1 %v2021_v45 }
 0x242   : > { %1389 = vmatprep.subr.bf16.mxu0 %v2020_v42  ;;  %1432 = vmatprep.subr.bf16.mxu1 %v2029_v47 }
 0x245   : > { %1390 = vmatpush1.bf16.msra.mxu0 %v2018_v44  ;;  %1433 = vmatpush1.bf16.msra.mxu1 %v2027_v49  ;;  %v967_v44 = vlaneseq }
 0x246   : > { %1391 = vmatprep.subr.bf16.mxu0 %v2026_v46  ;;  %1434 = vmatprep.subr.bf16.mxu1 %v2035_v51 }
 0x247   : > { %v968_v45 = vshrl.u32 %v967_v44, 7 }
 0x249   : > { %1392 = vmatpush1.bf16.msra.mxu0 %v2024_v48  ;;  %1435 = vmatpush1.bf16.msra.mxu1 %v2033_v53  ;;  %v2617_v46 = vsub.s32 0, %v968_v45  ;;  %v2619_v47 = vsub.s32 1, %v968_v45  ;;  %v965_v48 = vld [vmem:[%s2741_s6] sm:$0xf]  ;;  %v2627_v49 = vsub.s32 2, %v968_v45 }
 0x24a   : > { %1393 = vmatprep.subr.bf16.mxu0 %v2032_v50  ;;  %1436 = vmatprep.subr.bf16.mxu1 %v2041_v55  ;;  %v961_v53 = vld [vmem:[%s497_s30] sm:$0xff] }
 0x24b   : > { %v970_v50 = vrot.slane %v965_v48, %v2617_v46  ;;  %v974_v51 = vrot.slane %v965_v48, %v2619_v47  ;;  %v978_v55 = vrot.slane %v965_v48, %v2627_v49 }
 0x24d   : > { %1394 = vmatpush1.bf16.msra.mxu0 %v2030_v52  ;;  %1437 = vmatpush2.bf16.msra.mxu1 %v2039_v57  ;;  %v2631_v52 = vsub.s32 3, %v968_v45  ;;  %v987_v57 = vadd.f32 %v970_v50, %v961_v53 }
 0x24e   : > { %1395 = vmatprep.subr.bf16.mxu0 %v2038_v54  ;;  %1438 = vmatprep.subr.bf16.mxu1 %v2047_v59  ;;  %v962_v54 = vld [vmem:[%s497_s30 + $0x8] sm:$0xff] }
 0x24f   : > { %v982_v59 = vrot.slane %v965_v48, %v2631_v52 }
 0x251   : > { %1396 = vmatpush2.bf16.msra.mxu0 %v2036_v56  ;;  %1439 = vmatpush2.bf16.msra.mxu1 %v2045_v61  ;;  %v963_v56 = vld [vmem:[%s497_s30 + $0x10] sm:$0xff] }
 0x252   : > { %1397 = vmatprep.subr.bf16.mxu0 %v2044_v58  ;;  %1440 = vmatprep.subr.bf16.mxu1 %v2053_v63  ;;  %v988_v58 = vadd.f32 %v974_v51, %v962_v54  ;;  %v989_v63 = vadd.f32 %v978_v55, %v963_v56 }
 0x255   : > { %1398 = vmatpush2.bf16.msra.mxu0 %v2042_v60  ;;  %1441 = vmatpush2.bf16.msra.mxu1 %v2051_v2 }
 0x256   : > { %1399 = vmatprep.subr.bf16.mxu0 %v2050_v62  ;;  %1442 = vmatprep.subr.bf16.mxu1 %v2059_v4  ;;  %v964_v62 = vld [vmem:[%s497_s30 + $0x18] sm:$0xff] }
 0x259   : > { %1400 = vmatpush2.bf16.msra.mxu0 %v2048_v1  ;;  %1443 = vmatpush2.bf16.msra.mxu1 %v2057_v6 }
 0x25a   : > { %1401 = vmatprep.subr.bf16.mxu0 %v2056_v3  ;;  %1444 = vmatprep.subr.bf16.mxu1 %v2065_v10 }
 0x25d   : > { %1402 = vmatpush2.bf16.msra.mxu0 %v2054_v5  ;;  %1445 = vmatpush2.bf16.msra.mxu1 %v2063_v9  ;;  %v990_v5 = vadd.f32 %v982_v59, %v964_v62 }
 0x25e   : > { %1403 = vmatprep.subr.bf16.mxu0 %v2062_v8  ;;  %1446 = vmatprep.subr.bf16.mxu1 %v2068_v11 }
 0x261   : > { %1404 = vmatpush2.bf16.msra.mxu0 %v2060_v7  ;;  %1447 = vmatpush2.bf16.msra.mxu1 %v2066_v12 }
 0x262   : > { %1405 = vmatprep.subr.bf16.mxu0 %v2071_v13  ;;  %1448 = vmatprep.subr.bf16.mxu1 %v2077_v18 }
 0x265   : > { %1406 = vmatpush2.bf16.msra.mxu0 %v2069_v14  ;;  %1449 = vmatpush2.bf16.msra.mxu1 %v2075_v16 }
 0x266   : > { %1407 = vmatprep.subr.bf16.mxu0 %v2074_v15  ;;  %1450 = vmatprep.subr.bf16.mxu1 %v2083_v20 }
 0x269   : > { %1408 = vmatpush2.bf16.msra.mxu0 %v2072_v17  ;;  %1451 = vmatpush2.bf16.msra.mxu1 %v2081_v22 }
 0x26a   : > { %1409 = vmatprep.subr.bf16.mxu0 %v2080_v19 }
 0x26d   : > { %1410 = vmatpush2.bf16.msra.mxu0 %v2078_v23 }
 0x2e4   : > { %v850_v21 = vpop.f32.mrf.mxu1 }
 0x2e5   : > { %950 = vrot.lane.b32.xlu1 %v850_v21, %s2213_s12 }
 0x2e6   : > { %v1909_v0 = vpop.f32.mrf.mxu1 }
 0x2e8   : > { %v804_v24 = vpop.f32.mrf.mxu0  ;;  %v853_v25 = vpop.f32.mrf.mxu1 }
 0x2e9   : > { %948 = vst.msk [vmem:[#allocation2] sm:$0xff] %vm515_vm1, %v804_v24 }
 0x2ea   : > { %v1903_v26 = vpop.f32.mrf.mxu0  ;;  %v1910_v27 = vpop.f32.mrf.mxu1 }
 0x2ec   : > { %v807_v28 = vpop.f32.mrf.mxu0  ;;  %v942_v29 = vpop.f32.mrf.mxu1 }
 0x2ed   : > { %957 = vrot.lane.b32.xlu0 %v942_v29, %s2213_s12 }
 0x2ee   : > { %v1904_v30 = vpop.f32.mrf.mxu0  ;;  %v1921_v31 = vpop.f32.mrf.mxu1 }
 0x2f0   : > { %v896_v32 = vpop.f32.mrf.mxu0  ;;  %v945_v33 = vpop.f32.mrf.mxu1 }
 0x2f1   : > { %955 = vst.msk [vmem:[#allocation2 + $0x8] sm:$0xff] %vm515_vm1, %v896_v32 }
 0x2f2   : > { %v1915_v34 = vpop.f32.mrf.mxu0  ;;  %v1922_v35 = vpop.f32.mrf.mxu1 }
 0x2f4   : > { %v899_v36 = vpop.f32.mrf.mxu0 }
 0x2f6   : > { %v1916_v37 = vpop.f32.mrf.mxu0 }
 0x357   : > { %v951_v38 = vpop.permute.xlu1 %950 }
 0x358   : > { %954 = vst.msk [vmem:[#allocation2] sm:$0xff] %vm953_vm7, %v951_v38 }
 0x35f   : > { %v958_v39 = vpop.permute.xlu0 %957  ;;  %v991_v40 = vld [vmem:[#allocation2] sm:$0xff] }
 0x360   : > { %960 = vst.msk [vmem:[#allocation2 + $0x8] sm:$0xff] %vm953_vm7, %v958_v39  ;;  %v993_v43 = vpack.c.bf16 %v991_v40, %v991_v40 }
 0x367   : > { %v992_v41 = vld [vmem:[#allocation2 + $0x8] sm:$0xff] }
 0x368   : > { %v994_v42 = vpack.c.bf16 %v992_v41, %v992_v41 }
 0x36a   : > { %1411 = vmatprep.mubr.bf16.mxu0 %v994_v42  ;;  %1452 = vmatprep.mubr.bf16.mxu1 %v994_v42 }
 0x36b   : > { %1412 = vmatmul.mubr.bf16.vlgmr.msra.gmra.mxu0 %v993_v43  ;;  %1453 = vmatmul.mubr.bf16.vlgmr.msra.gmra.mxu1 %v993_v43 }
 0x42b   : > { %v1413_v60 = vpop.f32.mrf.mxu0  ;;  %v1454_v61 = vpop.f32.mrf.mxu1 }
 0x42c   : > { %v1461_v3 = vadd.f32 %v1413_v60, %v987_v57  ;;  %v1463_v8 = vadd.f32 %v1454_v61, %v989_v63 }
 0x42d   : > { %v1415_v1 = vpop.f32.mrf.mxu0  ;;  %v1456_v2 = vpop.f32.mrf.mxu1 }
 0x42e   : > { %v1462_v4 = vadd.f32 %v1415_v1, %v988_v58  ;;  %v1464_v12 = vadd.f32 %v1456_v2, %v990_v5 }
 0x42f   : > { %v1417_v6 = vpop.f32.mrf.mxu0  ;;  %v1458_v7 = vpop.f32.mrf.mxu1 }
 0x430   : > { %v1465_v9 = vadd.f32 %v1462_v4, %v1461_v3 }
 0x431   : > { %v1418_v10 = vpop.f32.mrf.mxu0  ;;  %v1459_v11 = vpop.f32.mrf.mxu1 }
 0x432   : > { %v1466_v13 = vadd.f32 %v1465_v9, %v1463_v8 }
 0x434   : > { %v1467_v14 = vadd.f32 %v1466_v13, %v1464_v12 }
 0x436   : > { %1468 = vadd.xlane.f32.xlu1 %v1467_v14 }
 0x4bf   : > { %v1469_v15 = vpop.xlane.xlu1 %1468 }
 0x4c0   : > { %v1471_v16 = vmul.f32 0.001953125, %v1469_v15 }
 0x4c2   : > { %v1472_v17 = vsub.f32 %v1461_v3, %v1471_v16  ;;  %v1473_v18 = vsub.f32 %v1462_v4, %v1471_v16  ;;  %v1474_v19 = vsub.f32 %v1463_v8, %v1471_v16  ;;  %v1475_v20 = vsub.f32 %v1464_v12, %v1471_v16 }
 0x4c4   : > { %v1476_v21 = vmul.f32 %v1472_v17, %v1472_v17  ;;  %v1477_v22 = vmul.f32 %v1473_v18, %v1473_v18  ;;  %v1478_v23 = vmul.f32 %v1474_v19, %v1474_v19  ;;  %v1479_v24 = vmul.f32 %v1475_v20, %v1475_v20 }
 0x4c6   : > { %v1480_v0 = vadd.f32 %v1477_v22, %v1476_v21 }
 0x4c8   : > { %v1481_v25 = vadd.f32 %v1480_v0, %v1478_v23 }
 0x4ca   : > { %v1482_v26 = vadd.f32 %v1481_v25, %v1479_v24 }
 0x4cc   : > { %1483 = vadd.xlane.f32.xlu0 %v1482_v26 }
 0x4cd   : > { %2115 = shalt.err (!%p2112_p5)
}
 0x4ce   : > { %s2116_s29 = scalar_lea.hbm %s2640_s2, 256  ;;  %s2120_s0 = scalar_lea.hbm %s2745_s10, 512 }
 0x4cf   : > { %p2117_p6 = scmp.ne.s32.totalorder %s2640_s2, %s2116_s29  ;;  %p2121_p10 = scmp.lt.s32.totalorder %s2640_s2, %s2745_s10 }
 0x4d0   : > { %p2122_p11 = scmp.lt.s32.totalorder %s2120_s0, %s2116_s29 }
 0x4d1   : > { %p2118_p7 = pnand %p2117_p6, %p2312_p4 }
 0x4d2   : > { %p2123_p12 = por %p2122_p11, %p2121_p10 }
 0x4d3   : > { %p2119_p9 = pneg %p2118_p7 }
 0x4d5   : > { %p2124_p13 = pnand %p2123_p12, %p2119_p9 }
 0x4d7   : > { %2127 = shalt.err (!%p2124_p13)
}
 0x4d8   : > { %s2215_s19 = smov 4   ;;  %v1492_v30 = vld [vmem:[%s2742_s7] sm:$0xf]  ;;  %s1762_s29 = sshll.u32 %s2399_s28, 5 }
 0x4d9   : > { %1924 = dma.vmem_to_hbm [thread:$0]  (%p2312_p4), %s2642_s11, 256, %s2640_s2, %s1554_s3, %s2213_s12, %s2213_s12, %s2215_s19   ;;  %v1497_v32 = vrot.slane %v1492_v30, %v2617_v46  ;;  %v1505_v33 = vrot.slane %v1492_v30, %v2627_v49  ;;  %v1501_v34 = vrot.slane %v1492_v30, %v2619_v47  ;;  %v1509_v35 = vrot.slane %v1492_v30, %v2631_v52 }
 0x4da   : > { %v1518_v31 = vld [vmem:[%s2743_s8] sm:$0xf]  ;;  %s1857_s12 = sshll.u32 %s2200_s16, 9  ;;  %s456_s11 = scalar_lea.vmem [#allocation3], %s1762_s29 }
 0x4db   : > { %v1523_v37 = vrot.slane %v1518_v31, %v2617_v46  ;;  %v1531_v38 = vrot.slane %v1518_v31, %v2627_v49  ;;  %v1527_v39 = vrot.slane %v1518_v31, %v2619_v47  ;;  %v1535_v40 = vrot.slane %v1518_v31, %v2631_v52  ;;  %s1570_s2 = sshll.u32 %s456_s11, 4  ;;  %s2688_s1 = scalar_lea.hbm %s2744_s9, %s1857_s12  ;;  %s2690_s2 = int_to_ptr.vmem [resolvable:$true] %s1570_s2 }
 0x4dc   : > { %s1549_s16 = scalar_lea.sflag [#allocation4], %s2399_s28  ;;  %s2128_s20 = scalar_lea.vmem %s2690_s2, 512 }
 0x4dd   : > { %p2129_p0 = scmp.ne.s32.totalorder %s2690_s2, %s2128_s20  ;;  %s2216_s19 = smov [#allocation3]  }
 0x4de   : > { %s2132_s24 = sshll.u32 %s2216_s19, 4  ;;  %s2133_s24 = int_to_ptr.vmem [resolvable:$false] %s2132_s24 }
 0x4df   : > { %p2130_p1 = pnand %p2129_p0, %p2312_p4  ;;  %s2134_s22 = scalar_lea.vmem %s2133_s24, 1024 }
 0x4e0   : > { %p2135_p3 = scmp.lt.s32.totalorder %s2690_s2, %s2133_s24  ;;  %p2136_p5 = scmp.lt.s32.totalorder %s2134_s22, %s2128_s20 }
 0x4e1   : > { %p2131_p2 = pneg %p2130_p1 }
 0x4e2   : > { %p2137_p6 = por %p2136_p5, %p2135_p3 }
 0x4e4   : > { %p2138_p7 = pnand %p2137_p6, %p2131_p2 }
 0x555   : > { %v1484_v27 = vpop.xlane.xlu0 %1483 }
 0x556   : > { %v1485_v28 = vmul.f32 0.001953125, %v1484_v27 }
 0x558   : > { %v1486_v29 = vadd.f32 1e-05, %v1485_v28 }
 0x55a   : > { %2100 = vrsqrt.f32 %v1486_v29 }
 0x567   : > { %v2101_v36 = vpop.eup %2100 }
 0x568   : > { %v1488_v41 = vmul.f32 %v2101_v36, %v1472_v17  ;;  %v1489_v42 = vmul.f32 %v2101_v36, %v1473_v18  ;;  %v1490_v43 = vmul.f32 %v2101_v36, %v1474_v19  ;;  %v1491_v44 = vmul.f32 %v2101_v36, %v1475_v20 }
 0x56a   : > { %v1514_v45 = vmul.f32 %v1497_v32, %v1488_v41  ;;  %v1515_v48 = vmul.f32 %v1501_v34, %v1489_v42  ;;  %v1516_v50 = vmul.f32 %v1505_v33, %v1490_v43  ;;  %v1517_v51 = vmul.f32 %v1509_v35, %v1491_v44 }
 0x56c   : > { %v1540_v46 = vadd.f32 %v1523_v37, %v1514_v45  ;;  %v1541_v53 = vadd.f32 %v1527_v39, %v1515_v48  ;;  %v1542_v49 = vadd.f32 %v1531_v38, %v1516_v50  ;;  %v1543_v54 = vadd.f32 %v1535_v40, %v1517_v51 }
 0x56e   : > { %1544 = vst [vmem:[%s456_s11] sm:$0xff] %v1540_v46  ;;  %1545 = vst [vmem:[%s456_s11 + $0x8] sm:$0xff] %v1541_v53 }
 0x56f   : > { %1546 = vst [vmem:[%s456_s11 + $0x10] sm:$0xff] %v1542_v49  ;;  %1547 = vst [vmem:[%s456_s11 + $0x18] sm:$0xff] %v1543_v54 }
 0x570   : > { %2141 = shalt.err (!%p2138_p7)
}
 0x571   : > { %s2142_s29 = scalar_lea.hbm %s2688_s1, 512  ;;  %s2146_s27 = scalar_lea.hbm %s2744_s9, 1024 }
 0x572   : > { %p2143_p9 = scmp.ne.s32.totalorder %s2688_s1, %s2142_s29  ;;  %p2147_p12 = scmp.lt.s32.totalorder %s2688_s1, %s2744_s9 }
 0x573   : > { %p2148_p13 = scmp.lt.s32.totalorder %s2146_s27, %s2142_s29 }
 0x574   : > { %p2144_p10 = pnand %p2143_p9, %p2312_p4 }
 0x575   : > { %p2149_p0 = por %p2148_p13, %p2147_p12 }
 0x576   : > { %p2145_p11 = pneg %p2144_p10 }
 0x578   : > { %p2150_p1 = pnand %p2149_p0, %p2145_p11 }
 0x57a   : > { %2153 = shalt.err (!%p2150_p1)
}
 0x57b   : > { %1923 = dma.vmem_to_hbm [thread:$0]  (%p2312_p4), %s2690_s2, 512, %s2688_s1, %s1549_s16  }
 0x57c PF: > { %p1934_p2 = scmp.ge.s32.totalorder %s2208_s18, 2  ;;  %s1599_s3 = sand.u32 1, %s2188_s13  }
 0x57d   : > { %s1600_s0 = scalar_lea.sflag [#allocation4], %s1599_s3 }
 0x57e   : > { %p1928_p3 = pnand %p1934_p2, %p2319_p8 }
 0x580   : > { %p1929_p5 = pneg %p1928_p3 }
 0x582   : > { %2179 = dma.done.wait (%p1929_p5), %s1600_s0, 512  }
 0x583   : > { %2181 = vsyncadd (%p1929_p5), %s1600_s0, 4294966784  ;;  %s1609_s20 = scalar_lea.sflag [#allocation6], %s1599_s3 }
 0x584   : > { %2183 = dma.done.wait (%p1929_p5), %s1609_s20, 256  }
 0x585   : > { %2185 = vsyncadd (%p1929_p5), %s1609_s20, 4294967040  ;;  %s27_s18 = sadd.s32 1, %s2208_s18   ;;  %s2758_s13 = smov %s2192_s14 }
 0x586   : > { %p24_p6 = scmp.ge.s32.totalorder %s27_s18, 4   ;;  %s2759_s14 = smov %s2196_s15 }
 0x587   : > { %s2760_s15 = smov %s2325_s26  ;;  %s2761_s16 = smov %s2204_s17 }
 0x588   : > { %s2762_s17 = smov %s2764_s21  ;;  %26 = sbr.rel (!%p24_p6) target bundleno = 11 (0xb), region = 120 }
 0x58d   :  { %1614 = vsyncpa [#allocation4], 1 }
 0x58e   :  { %1616 = vsyncpa [#allocation4 + $0x1], 1 }
 0x58f   :  { %1617 = vsyncpa [#allocation6], 1 }
 0x590   :  { %1619 = vsyncpa [#allocation6 + $0x1], 1 }

// kernel: multi_head_attention.2
= control target key start
LH: loop header
LB: loop body
LE: loop exit
PB: predicated region body
PF: predicated region fallthrough
CT: control target
= control target key end

     0   :  { %s2786_s3 = inlined_call_operand.vmem [shape: bf16[512,256], index: 3, kind: input, shape index: {}]   ;;  %s2787_s0 = inlined_call_operand.vmem [shape: f32[16,512], index: 0, kind: input, shape index: {}]   ;;  %s2788_s4 = inlined_call_operand.vmem [shape: bf16[512,256], index: 4, kind: input, shape index: {}]   ;;  %s2789_s1 = inlined_call_operand.vmem [shape: f32[16,512], index: 1, kind: input, shape index: {}]   ;;  %s2790_s5 = inlined_call_operand.vmem [shape: bf16[512,256], index: 5, kind: input, shape index: {}]   ;;  %s2791_s2 = inlined_call_operand.vmem [shape: f32[16,512], index: 2, kind: input, shape index: {}]   ;;  %s2792_s6 = inlined_call_operand.vmem [shape: f32[3,256], index: 6, kind: input, shape index: {}]   ;;  %s2793_s7 = inlined_call_operand.vmem [shape: bf16[16,256], index: 7, kind: output, shape index: {0}]   ;;  %s2794_s8 = inlined_call_operand.vmem [shape: bf16[16,256], index: 8, kind: output, shape index: {1}]   ;;  %s2795_s9 = inlined_call_operand.vmem [shape: bf16[16,256], index: 9, kind: output, shape index: {2}]  }
   0x1   :  { %v1773_v0 = vld [vmem:[%s2786_s3 + $0x74] ss:$8 sps:$4 sm:$0xff]   ;;  %v1777_v2 = vld [vmem:[%s2786_s3 + $0x70] ss:$8 sps:$4 sm:$0xff]   ;;  %v1779_v4 = vld [vmem:[%s2786_s3 + $0x64] ss:$8 sps:$4 sm:$0xff]  }
   0x2   :  { %v1775_v1 = vld [vmem:[%s2786_s3 + $0x174] ss:$8 sps:$4 sm:$0xff]   ;;  %437 = vmatprep.subr.bf16.mxu0 %v1773_v0  ;;  %v1778_v3 = vld [vmem:[%s2786_s3 + $0x170] ss:$8 sps:$4 sm:$0xff]   ;;  %v1781_v5 = vld [vmem:[%s2786_s3 + $0x164] ss:$8 sps:$4 sm:$0xff]  }
   0x3   :  { %480 = vmatprep.subr.bf16.mxu1 %v1775_v1  ;;  %438 = vmatpush1.bf16.msra.mxu0 %v1777_v2  ;;  %v1783_v6 = vld [vmem:[%s2786_s3 + $0x60] ss:$8 sps:$4 sm:$0xff]   ;;  %v1785_v8 = vld [vmem:[%s2786_s3 + $0x54] ss:$8 sps:$4 sm:$0xff]   ;;  %v1789_v10 = vld [vmem:[%s2786_s3 + $0x50] ss:$8 sps:$4 sm:$0xff]  }
   0x4   :  { %481 = vmatpush1.bf16.msra.mxu1 %v1778_v3  ;;  %439 = vmatprep.subr.bf16.mxu0 %v1779_v4  ;;  %v1784_v7 = vld [vmem:[%s2786_s3 + $0x160] ss:$8 sps:$4 sm:$0xff]   ;;  %v1787_v9 = vld [vmem:[%s2786_s3 + $0x154] ss:$8 sps:$4 sm:$0xff]   ;;  %v1790_v11 = vld [vmem:[%s2786_s3 + $0x150] ss:$8 sps:$4 sm:$0xff]  }
   0x5   :  { %482 = vmatprep.subr.bf16.mxu1 %v1781_v5  ;;  %v1791_v12 = vld [vmem:[%s2786_s3 + $0x44] ss:$8 sps:$4 sm:$0xff]   ;;  %v1795_v14 = vld [vmem:[%s2786_s3 + $0x40] ss:$8 sps:$4 sm:$0xff]   ;;  %v1797_v16 = vld [vmem:[%s2786_s3 + $0x34] ss:$8 sps:$4 sm:$0xff]  }
   0x6   :  { %v1793_v13 = vld [vmem:[%s2786_s3 + $0x144] ss:$8 sps:$4 sm:$0xff]   ;;  %v1796_v15 = vld [vmem:[%s2786_s3 + $0x140] ss:$8 sps:$4 sm:$0xff]   ;;  %v1799_v17 = vld [vmem:[%s2786_s3 + $0x134] ss:$8 sps:$4 sm:$0xff]  }
   0x7   :  { %440 = vmatpush1.bf16.msra.mxu0 %v1783_v6  ;;  %v1801_v18 = vld [vmem:[%s2786_s3 + $0x30] ss:$8 sps:$4 sm:$0xff]   ;;  %v1803_v20 = vld [vmem:[%s2786_s3 + $0x24] ss:$8 sps:$4 sm:$0xff]   ;;  %v1807_v22 = vld [vmem:[%s2786_s3 + $0x20] ss:$8 sps:$4 sm:$0xff]  }
   0x8   :  { %483 = vmatpush1.bf16.msra.mxu1 %v1784_v7  ;;  %441 = vmatprep.subr.bf16.mxu0 %v1785_v8  ;;  %v1802_v19 = vld [vmem:[%s2786_s3 + $0x130] ss:$8 sps:$4 sm:$0xff]   ;;  %v1805_v21 = vld [vmem:[%s2786_s3 + $0x124] ss:$8 sps:$4 sm:$0xff]   ;;  %v1808_v23 = vld [vmem:[%s2786_s3 + $0x120] ss:$8 sps:$4 sm:$0xff]  }
   0x9   :  { %484 = vmatprep.subr.bf16.mxu1 %v1787_v9  ;;  %v1809_v24 = vld [vmem:[%s2786_s3 + $0x14] ss:$8 sps:$4 sm:$0xff]   ;;  %v1813_v26 = vld [vmem:[%s2786_s3 + $0x10] ss:$8 sps:$4 sm:$0xff]   ;;  %v1815_v28 = vld [vmem:[%s2786_s3 + $0x4] ss:$8 sps:$4 sm:$0xff]  }
   0xa   :  { %v1811_v25 = vld [vmem:[%s2786_s3 + $0x114] ss:$8 sps:$4 sm:$0xff]   ;;  %v1814_v27 = vld [vmem:[%s2786_s3 + $0x110] ss:$8 sps:$4 sm:$0xff]   ;;  %v1817_v29 = vld [vmem:[%s2786_s3 + $0x104] ss:$8 sps:$4 sm:$0xff]  }
   0xb   :  { %442 = vmatpush1.bf16.msra.mxu0 %v1789_v10  ;;  %v1819_v30 = vld [vmem:[%s2786_s3] ss:$8 sps:$4 sm:$0xff]   ;;  %v1821_v32 = vld [vmem:[%s2786_s3 + $0xf4] ss:$8 sps:$4 sm:$0xff]   ;;  %v1825_v34 = vld [vmem:[%s2786_s3 + $0xf0] ss:$8 sps:$4 sm:$0xff]  }
   0xc   :  { %485 = vmatpush1.bf16.msra.mxu1 %v1790_v11  ;;  %443 = vmatprep.subr.bf16.mxu0 %v1791_v12  ;;  %v1820_v31 = vld [vmem:[%s2786_s3 + $0x100] ss:$8 sps:$4 sm:$0xff]   ;;  %v1823_v33 = vld [vmem:[%s2786_s3 + $0x1f4] ss:$8 sps:$4 sm:$0xff]   ;;  %v1826_v35 = vld [vmem:[%s2786_s3 + $0x1f0] ss:$8 sps:$4 sm:$0xff]  }
   0xd   :  { %486 = vmatprep.subr.bf16.mxu1 %v1793_v13  ;;  %v1827_v36 = vld [vmem:[%s2786_s3 + $0xe4] ss:$8 sps:$4 sm:$0xff]   ;;  %v1831_v38 = vld [vmem:[%s2786_s3 + $0xe0] ss:$8 sps:$4 sm:$0xff]   ;;  %v1833_v40 = vld [vmem:[%s2786_s3 + $0xd4] ss:$8 sps:$4 sm:$0xff]  }
   0xe   :  { %v1829_v37 = vld [vmem:[%s2786_s3 + $0x1e4] ss:$8 sps:$4 sm:$0xff]   ;;  %v1832_v39 = vld [vmem:[%s2786_s3 + $0x1e0] ss:$8 sps:$4 sm:$0xff]   ;;  %v1835_v41 = vld [vmem:[%s2786_s3 + $0x1d4] ss:$8 sps:$4 sm:$0xff]  }
   0xf   :  { %444 = vmatpush1.bf16.msra.mxu0 %v1795_v14  ;;  %v1837_v42 = vld [vmem:[%s2786_s3 + $0xd0] ss:$8 sps:$4 sm:$0xff]   ;;  %v1839_v44 = vld [vmem:[%s2786_s3 + $0xc4] ss:$8 sps:$4 sm:$0xff]   ;;  %v1843_v50 = vld [vmem:[%s2786_s3 + $0xc0] ss:$8 sps:$4 sm:$0xff]  }
  0x10   :  { %487 = vmatpush1.bf16.msra.mxu1 %v1796_v15  ;;  %445 = vmatprep.subr.bf16.mxu0 %v1797_v16  ;;  %v1838_v43 = vld [vmem:[%s2786_s3 + $0x1d0] ss:$8 sps:$4 sm:$0xff]   ;;  %v1841_v45 = vld [vmem:[%s2786_s3 + $0x1c4] ss:$8 sps:$4 sm:$0xff]   ;;  %v1844_v51 = vld [vmem:[%s2786_s3 + $0x1c0] ss:$8 sps:$4 sm:$0xff]  }
  0x11   :  { %488 = vmatprep.subr.bf16.mxu1 %v1799_v17  ;;  %v30_v46 = vld [vmem:[%s2787_s0 + $0x8] sm:$0xff]  ;;  %v32_v48 = vld [vmem:[%s2787_s0 + $0x18] sm:$0xff]  ;;  %v29_v6 = vld [vmem:[%s2787_s0] sm:$0xff] }
  0x12   :  { %v34_v47 = vld [vmem:[%s2787_s0 + $0x28] sm:$0xff]  ;;  %v36_v49 = vld [vmem:[%s2787_s0 + $0x38] sm:$0xff]  ;;  %v33_v7 = vld [vmem:[%s2787_s0 + $0x20] sm:$0xff] }
  0x13   :  { %446 = vmatpush1.bf16.msra.mxu0 %v1801_v18  ;;  %v1845_v52 = vld [vmem:[%s2786_s3 + $0xb4] ss:$8 sps:$4 sm:$0xff]   ;;  %v38_v53 = vpack.c.bf16 %v34_v47, %v30_v46  ;;  %v40_v54 = vpack.c.bf16 %v36_v49, %v32_v48  ;;  %v1849_v56 = vld [vmem:[%s2786_s3 + $0xb0] ss:$8 sps:$4 sm:$0xff]   ;;  %v1851_v58 = vld [vmem:[%s2786_s3 + $0xa4] ss:$8 sps:$4 sm:$0xff]   ;;  %v37_v12 = vpack.c.bf16 %v33_v7, %v29_v6 }
  0x14   :  { %489 = vmatpush1.bf16.msra.mxu1 %v1802_v19  ;;  %447 = vmatprep.subr.bf16.mxu0 %v1803_v20  ;;  %v1847_v55 = vld [vmem:[%s2786_s3 + $0x1b4] ss:$8 sps:$4 sm:$0xff]   ;;  %v1850_v57 = vld [vmem:[%s2786_s3 + $0x1b0] ss:$8 sps:$4 sm:$0xff]   ;;  %v1853_v59 = vld [vmem:[%s2786_s3 + $0x1a4] ss:$8 sps:$4 sm:$0xff]  }
  0x15   :  { %490 = vmatprep.subr.bf16.mxu1 %v1805_v21  ;;  %469 = vmatprep.mubr.bf16.mxu0 %v38_v53  ;;  %v1855_v60 = vld [vmem:[%s2786_s3 + $0xa0] ss:$8 sps:$4 sm:$0xff]   ;;  %v1857_v62 = vld [vmem:[%s2786_s3 + $0x94] ss:$8 sps:$4 sm:$0xff]   ;;  %v1861_v0 = vld [vmem:[%s2786_s3 + $0x90] ss:$8 sps:$4 sm:$0xff]  }
  0x16   :  { %512 = vmatprep.mubr.bf16.mxu1 %v40_v54  ;;  %v1856_v61 = vld [vmem:[%s2786_s3 + $0x1a0] ss:$8 sps:$4 sm:$0xff]   ;;  %v1859_v63 = vld [vmem:[%s2786_s3 + $0x194] ss:$8 sps:$4 sm:$0xff]   ;;  %v1862_v1 = vld [vmem:[%s2786_s3 + $0x190] ss:$8 sps:$4 sm:$0xff]  }
  0x17   :  { %448 = vmatpush1.bf16.msra.mxu0 %v1807_v22  ;;  %v1863_v2 = vld [vmem:[%s2786_s3 + $0x84] ss:$8 sps:$4 sm:$0xff]   ;;  %v1867_v4 = vld [vmem:[%s2786_s3 + $0x80] ss:$8 sps:$4 sm:$0xff]   ;;  %v31_v8 = vld [vmem:[%s2787_s0 + $0x10] sm:$0xff] }
  0x18   :  { %491 = vmatpush1.bf16.msra.mxu1 %v1808_v23  ;;  %449 = vmatprep.subr.bf16.mxu0 %v1809_v24  ;;  %v1865_v3 = vld [vmem:[%s2786_s3 + $0x184] ss:$8 sps:$4 sm:$0xff]   ;;  %v1868_v5 = vld [vmem:[%s2786_s3 + $0x180] ss:$8 sps:$4 sm:$0xff]   ;;  %v35_v9 = vld [vmem:[%s2787_s0 + $0x30] sm:$0xff] }
  0x19   :  { %492 = vmatprep.subr.bf16.mxu1 %v1811_v25  ;;  %v1871_v10 = vld [vmem:[%s2788_s4 + $0x74] ss:$8 sps:$4 sm:$0xff]   ;;  %v39_v13 = vpack.c.bf16 %v35_v9, %v31_v8  ;;  %v1869_v14 = vld [vmem:[%s2788_s4 + $0x70] ss:$8 sps:$4 sm:$0xff]   ;;  %v1877_v16 = vld [vmem:[%s2788_s4 + $0x64] ss:$8 sps:$4 sm:$0xff]  }
  0x1a   :  { %v1874_v11 = vld [vmem:[%s2788_s4 + $0x174] ss:$8 sps:$4 sm:$0xff]   ;;  %v1872_v15 = vld [vmem:[%s2788_s4 + $0x170] ss:$8 sps:$4 sm:$0xff]   ;;  %v1880_v17 = vld [vmem:[%s2788_s4 + $0x164] ss:$8 sps:$4 sm:$0xff]  }
  0x1b   :  { %450 = vmatpush1.bf16.msra.mxu0 %v1813_v26  ;;  %v1875_v18 = vld [vmem:[%s2788_s4 + $0x60] ss:$8 sps:$4 sm:$0xff]   ;;  %v1883_v20 = vld [vmem:[%s2788_s4 + $0x54] ss:$8 sps:$4 sm:$0xff]   ;;  %v1881_v22 = vld [vmem:[%s2788_s4 + $0x50] ss:$8 sps:$4 sm:$0xff]  }
  0x1c   :  { %493 = vmatpush1.bf16.msra.mxu1 %v1814_v27  ;;  %451 = vmatprep.subr.bf16.mxu0 %v1815_v28  ;;  %v1878_v19 = vld [vmem:[%s2788_s4 + $0x160] ss:$8 sps:$4 sm:$0xff]   ;;  %v1886_v21 = vld [vmem:[%s2788_s4 + $0x154] ss:$8 sps:$4 sm:$0xff]   ;;  %v1884_v23 = vld [vmem:[%s2788_s4 + $0x150] ss:$8 sps:$4 sm:$0xff]  }
  0x1d   :  { %494 = vmatprep.subr.bf16.mxu1 %v1817_v29  ;;  %v1889_v24 = vld [vmem:[%s2788_s4 + $0x44] ss:$8 sps:$4 sm:$0xff]   ;;  %v1887_v26 = vld [vmem:[%s2788_s4 + $0x40] ss:$8 sps:$4 sm:$0xff]   ;;  %v1895_v28 = vld [vmem:[%s2788_s4 + $0x34] ss:$8 sps:$4 sm:$0xff]  }
  0x1e   :  { %v1892_v25 = vld [vmem:[%s2788_s4 + $0x144] ss:$8 sps:$4 sm:$0xff]   ;;  %v1890_v27 = vld [vmem:[%s2788_s4 + $0x140] ss:$8 sps:$4 sm:$0xff]   ;;  %v1898_v29 = vld [vmem:[%s2788_s4 + $0x134] ss:$8 sps:$4 sm:$0xff]  }
  0x1f   :  { %452 = vmatpush1.bf16.msra.mxu0 %v1819_v30  ;;  %v1893_v30 = vld [vmem:[%s2788_s4 + $0x30] ss:$8 sps:$4 sm:$0xff]   ;;  %v1911_v48 = vld [vmem:[%s2788_s4] ss:$8 sps:$4 sm:$0xff]   ;;  %v1925_v54 = vld [vmem:[%s2788_s4 + $0xe4] ss:$8 sps:$4 sm:$0xff]  }
  0x20   :  { %495 = vmatpush1.bf16.msra.mxu1 %v1820_v31  ;;  %453 = vmatprep.subr.bf16.mxu0 %v1821_v32  ;;  %v1896_v31 = vld [vmem:[%s2788_s4 + $0x130] ss:$8 sps:$4 sm:$0xff]   ;;  %v1901_v32 = vld [vmem:[%s2788_s4 + $0x24] ss:$8 sps:$4 sm:$0xff]   ;;  %v1914_v49 = vld [vmem:[%s2788_s4 + $0x100] ss:$8 sps:$4 sm:$0xff]  }
  0x21   :  { %496 = vmatprep.subr.bf16.mxu1 %v1823_v33  ;;  %v1904_v33 = vld [vmem:[%s2788_s4 + $0x124] ss:$8 sps:$4 sm:$0xff]   ;;  %v544_v46 = vld [vmem:[%s2789_s1 + $0x38] sm:$0xff]  ;;  %v1947_v8 = vld [vmem:[%s2788_s4 + $0xa0] ss:$8 sps:$4 sm:$0xff]  }
  0x22   :  { %v1920_v53 = vld [vmem:[%s2788_s4 + $0x1f0] ss:$8 sps:$4 sm:$0xff]   ;;  %v1949_v6 = vld [vmem:[%s2788_s4 + $0xa4] ss:$8 sps:$4 sm:$0xff]   ;;  %v1950_v9 = vld [vmem:[%s2788_s4 + $0x1a0] ss:$8 sps:$4 sm:$0xff]  }
  0x23   :  { %454 = vmatpush2.bf16.msra.mxu0 %v1825_v34  ;;  %v1899_v34 = vld [vmem:[%s2788_s4 + $0x20] ss:$8 sps:$4 sm:$0xff]   ;;  %v1952_v7 = vld [vmem:[%s2788_s4 + $0x1a4] ss:$8 sps:$4 sm:$0xff]  }
  0x24   :  { %497 = vmatpush2.bf16.msra.mxu1 %v1826_v35  ;;  %455 = vmatprep.subr.bf16.mxu0 %v1827_v36  ;;  %v1902_v35 = vld [vmem:[%s2788_s4 + $0x120] ss:$8 sps:$4 sm:$0xff]   ;;  %v1907_v36 = vld [vmem:[%s2788_s4 + $0x14] ss:$8 sps:$4 sm:$0xff]  }
  0x25   :  { %498 = vmatprep.subr.bf16.mxu1 %v1829_v37  ;;  %v1910_v37 = vld [vmem:[%s2788_s4 + $0x114] ss:$8 sps:$4 sm:$0xff]  }
  0x27   :  { %456 = vmatpush2.bf16.msra.mxu0 %v1831_v38  ;;  %v1905_v38 = vld [vmem:[%s2788_s4 + $0x10] ss:$8 sps:$4 sm:$0xff]  }
  0x28   :  { %499 = vmatpush2.bf16.msra.mxu1 %v1832_v39  ;;  %457 = vmatprep.subr.bf16.mxu0 %v1833_v40  ;;  %v1908_v39 = vld [vmem:[%s2788_s4 + $0x110] ss:$8 sps:$4 sm:$0xff]   ;;  %v538_v40 = vld [vmem:[%s2789_s1 + $0x8] sm:$0xff] }
  0x29   :  { %500 = vmatprep.subr.bf16.mxu1 %v1835_v41  ;;  %v542_v41 = vld [vmem:[%s2789_s1 + $0x28] sm:$0xff] }
  0x2b   :  { %458 = vmatpush2.bf16.msra.mxu0 %v1837_v42  ;;  %v540_v42 = vld [vmem:[%s2789_s1 + $0x18] sm:$0xff] }
  0x2c   :  { %501 = vmatpush2.bf16.msra.mxu1 %v1838_v43  ;;  %459 = vmatprep.subr.bf16.mxu0 %v1839_v44  ;;  %v1913_v43 = vld [vmem:[%s2788_s4 + $0x4] ss:$8 sps:$4 sm:$0xff]   ;;  %v548_v47 = vpack.c.bf16 %v544_v46, %v540_v42  ;;  %v1991_v46 = vld [vmem:[%s2790_s5 + $0x34] ss:$8 sps:$4 sm:$0xff]  }
  0x2d   :  { %502 = vmatprep.subr.bf16.mxu1 %v1841_v45  ;;  %v1916_v44 = vld [vmem:[%s2788_s4 + $0x104] ss:$8 sps:$4 sm:$0xff]   ;;  %v546_v45 = vpack.c.bf16 %v542_v41, %v538_v40  ;;  %v1977_v40 = vld [vmem:[%s2790_s5 + $0x50] ss:$8 sps:$4 sm:$0xff]  }
  0x2e   :  { %v1980_v41 = vld [vmem:[%s2790_s5 + $0x150] ss:$8 sps:$4 sm:$0xff]   ;;  %v1985_v42 = vld [vmem:[%s2790_s5 + $0x44] ss:$8 sps:$4 sm:$0xff]  }
  0x2f   :  { %460 = vmatpush2.bf16.msra.mxu0 %v1843_v50  ;;  %v1919_v50 = vld [vmem:[%s2788_s4 + $0xf4] ss:$8 sps:$4 sm:$0xff]  }
  0x30   :  { %503 = vmatpush2.bf16.msra.mxu1 %v1844_v51  ;;  %461 = vmatprep.subr.bf16.mxu0 %v1845_v52  ;;  %v1922_v51 = vld [vmem:[%s2788_s4 + $0x1f4] ss:$8 sps:$4 sm:$0xff]   ;;  %v1917_v52 = vld [vmem:[%s2788_s4 + $0xf0] ss:$8 sps:$4 sm:$0xff]  }
  0x31   :  { %504 = vmatprep.subr.bf16.mxu1 %v1847_v55  ;;  %v1928_v55 = vld [vmem:[%s2788_s4 + $0x1e4] ss:$8 sps:$4 sm:$0xff]  }
  0x33   :  { %462 = vmatpush2.bf16.msra.mxu0 %v1849_v56  ;;  %v1923_v56 = vld [vmem:[%s2788_s4 + $0xe0] ss:$8 sps:$4 sm:$0xff]  }
  0x34   :  { %505 = vmatpush2.bf16.msra.mxu1 %v1850_v57  ;;  %463 = vmatprep.subr.bf16.mxu0 %v1851_v58  ;;  %v1926_v57 = vld [vmem:[%s2788_s4 + $0x1e0] ss:$8 sps:$4 sm:$0xff]   ;;  %v1931_v58 = vld [vmem:[%s2788_s4 + $0xd4] ss:$8 sps:$4 sm:$0xff]  }
  0x35   :  { %506 = vmatprep.subr.bf16.mxu1 %v1853_v59  ;;  %v1934_v59 = vld [vmem:[%s2788_s4 + $0x1d4] ss:$8 sps:$4 sm:$0xff]  }
  0x37   :  { %464 = vmatpush2.bf16.msra.mxu0 %v1855_v60  ;;  %v1929_v60 = vld [vmem:[%s2788_s4 + $0xd0] ss:$8 sps:$4 sm:$0xff]  }
  0x38   :  { %507 = vmatpush2.bf16.msra.mxu1 %v1856_v61  ;;  %465 = vmatprep.subr.bf16.mxu0 %v1857_v62  ;;  %v1932_v61 = vld [vmem:[%s2788_s4 + $0x1d0] ss:$8 sps:$4 sm:$0xff]   ;;  %v1937_v62 = vld [vmem:[%s2788_s4 + $0xc4] ss:$8 sps:$4 sm:$0xff]  }
  0x39   :  { %508 = vmatprep.subr.bf16.mxu1 %v1859_v63  ;;  %v1940_v63 = vld [vmem:[%s2788_s4 + $0x1c4] ss:$8 sps:$4 sm:$0xff]  }
  0x3b   :  { %466 = vmatpush2.bf16.msra.mxu0 %v1861_v0  ;;  %v1935_v0 = vld [vmem:[%s2788_s4 + $0xc0] ss:$8 sps:$4 sm:$0xff]  }
  0x3c   :  { %509 = vmatpush2.bf16.msra.mxu1 %v1862_v1  ;;  %467 = vmatprep.subr.bf16.mxu0 %v1863_v2  ;;  %v1938_v1 = vld [vmem:[%s2788_s4 + $0x1c0] ss:$8 sps:$4 sm:$0xff]   ;;  %v1943_v2 = vld [vmem:[%s2788_s4 + $0xb4] ss:$8 sps:$4 sm:$0xff]  }
  0x3d   :  { %510 = vmatprep.subr.bf16.mxu1 %v1865_v3  ;;  %v1946_v3 = vld [vmem:[%s2788_s4 + $0x1b4] ss:$8 sps:$4 sm:$0xff]  }
  0x3f   :  { %468 = vmatpush2.bf16.msra.mxu0 %v1867_v4  ;;  %v1941_v4 = vld [vmem:[%s2788_s4 + $0xb0] ss:$8 sps:$4 sm:$0xff]  }
  0x40   :  { %511 = vmatpush2.bf16.msra.mxu1 %v1868_v5  ;;  %946 = vmatprep.subr.bf16.mxu0 %v1871_v10  ;;  %v1944_v5 = vld [vmem:[%s2788_s4 + $0x1b0] ss:$8 sps:$4 sm:$0xff]   ;;  %v1955_v10 = vld [vmem:[%s2788_s4 + $0x94] ss:$8 sps:$4 sm:$0xff]  }
  0x41   :  { %989 = vmatprep.subr.bf16.mxu1 %v1874_v11  ;;  %v1958_v11 = vld [vmem:[%s2788_s4 + $0x194] ss:$8 sps:$4 sm:$0xff]  }
  0x42   :  { %470 = vmatmul.mubr.bf16.vlgmr.msra.gmra.mxu0 %v37_v12  ;;  %v1953_v12 = vld [vmem:[%s2788_s4 + $0x90] ss:$8 sps:$4 sm:$0xff]  }
  0x43   :  { %513 = vmatmul.mubr.bf16.vlgmr.msra.gmra.mxu1 %v39_v13  ;;  %947 = vmatpush1.bf16.msra.mxu0 %v1869_v14  ;;  %v1956_v13 = vld [vmem:[%s2788_s4 + $0x190] ss:$8 sps:$4 sm:$0xff]   ;;  %v1961_v14 = vld [vmem:[%s2788_s4 + $0x84] ss:$8 sps:$4 sm:$0xff]  }
  0x44   :  { %990 = vmatpush1.bf16.msra.mxu1 %v1872_v15  ;;  %948 = vmatprep.subr.bf16.mxu0 %v1877_v16  ;;  %v1964_v15 = vld [vmem:[%s2788_s4 + $0x184] ss:$8 sps:$4 sm:$0xff]   ;;  %v1959_v16 = vld [vmem:[%s2788_s4 + $0x80] ss:$8 sps:$4 sm:$0xff]  }
  0x45   :  { %991 = vmatprep.subr.bf16.mxu1 %v1880_v17  ;;  %978 = vmatprep.mubr.bf16.mxu0 %v546_v45  ;;  %v1962_v17 = vld [vmem:[%s2788_s4 + $0x180] ss:$8 sps:$4 sm:$0xff]  }
  0x46   :  { %1021 = vmatprep.mubr.bf16.mxu1 %v548_v47  ;;  %v1986_v45 = vld [vmem:[%s2790_s5 + $0x140] ss:$8 sps:$4 sm:$0xff]   ;;  %v1994_v47 = vld [vmem:[%s2790_s5 + $0x134] ss:$8 sps:$4 sm:$0xff]  }
  0x47   :  { %949 = vmatpush1.bf16.msra.mxu0 %v1875_v18  ;;  %v537_v18 = vld [vmem:[%s2789_s1] sm:$0xff] }
  0x48   :  { %992 = vmatpush1.bf16.msra.mxu1 %v1878_v19  ;;  %950 = vmatprep.subr.bf16.mxu0 %v1883_v20  ;;  %v541_v19 = vld [vmem:[%s2789_s1 + $0x20] sm:$0xff]  ;;  %v539_v20 = vld [vmem:[%s2789_s1 + $0x10] sm:$0xff] }
  0x49   :  { %993 = vmatprep.subr.bf16.mxu1 %v1886_v21  ;;  %v543_v21 = vld [vmem:[%s2789_s1 + $0x30] sm:$0xff] }
  0x4b   :  { %951 = vmatpush1.bf16.msra.mxu0 %v1881_v22  ;;  %v1967_v22 = vld [vmem:[%s2790_s5 + $0x74] ss:$8 sps:$4 sm:$0xff]  }
  0x4c   :  { %994 = vmatpush1.bf16.msra.mxu1 %v1884_v23  ;;  %952 = vmatprep.subr.bf16.mxu0 %v1889_v24  ;;  %v1970_v23 = vld [vmem:[%s2790_s5 + $0x174] ss:$8 sps:$4 sm:$0xff]   ;;  %v545_v24 = vpack.c.bf16 %v541_v19, %v537_v18  ;;  %v2045_v18 = vld [vmem:[%s2790_s5 + $0xa4] ss:$8 sps:$4 sm:$0xff]  }
  0x4d   :  { %995 = vmatprep.subr.bf16.mxu1 %v1892_v25  ;;  %v547_v25 = vpack.c.bf16 %v543_v21, %v539_v20  ;;  %v2048_v19 = vld [vmem:[%s2790_s5 + $0x1a4] ss:$8 sps:$4 sm:$0xff]   ;;  %v2043_v20 = vld [vmem:[%s2790_s5 + $0xa0] ss:$8 sps:$4 sm:$0xff]  }
  0x4e   :  { %v2046_v21 = vld [vmem:[%s2790_s5 + $0x1a0] ss:$8 sps:$4 sm:$0xff]  }
  0x4f   :  { %953 = vmatpush1.bf16.msra.mxu0 %v1887_v26  ;;  %v1965_v26 = vld [vmem:[%s2790_s5 + $0x70] ss:$8 sps:$4 sm:$0xff]  }
  0x50   :  { %996 = vmatpush1.bf16.msra.mxu1 %v1890_v27  ;;  %954 = vmatprep.subr.bf16.mxu0 %v1895_v28  ;;  %v1968_v27 = vld [vmem:[%s2790_s5 + $0x170] ss:$8 sps:$4 sm:$0xff]   ;;  %v1973_v28 = vld [vmem:[%s2790_s5 + $0x64] ss:$8 sps:$4 sm:$0xff]  }
  0x51   :  { %997 = vmatprep.subr.bf16.mxu1 %v1898_v29  ;;  %v1976_v29 = vld [vmem:[%s2790_s5 + $0x164] ss:$8 sps:$4 sm:$0xff]  }
  0x53   :  { %955 = vmatpush1.bf16.msra.mxu0 %v1893_v30  ;;  %v1971_v30 = vld [vmem:[%s2790_s5 + $0x60] ss:$8 sps:$4 sm:$0xff]  }
  0x54   :  { %998 = vmatpush1.bf16.msra.mxu1 %v1896_v31  ;;  %956 = vmatprep.subr.bf16.mxu0 %v1901_v32  ;;  %v1974_v31 = vld [vmem:[%s2790_s5 + $0x160] ss:$8 sps:$4 sm:$0xff]   ;;  %v1979_v32 = vld [vmem:[%s2790_s5 + $0x54] ss:$8 sps:$4 sm:$0xff]  }
  0x55   :  { %999 = vmatprep.subr.bf16.mxu1 %v1904_v33  ;;  %v1982_v33 = vld [vmem:[%s2790_s5 + $0x154] ss:$8 sps:$4 sm:$0xff]  }
  0x57   :  { %957 = vmatpush1.bf16.msra.mxu0 %v1899_v34  ;;  %v1047_v34 = vld [vmem:[%s2791_s2 + $0x8] sm:$0xff] }
  0x58   :  { %1000 = vmatpush1.bf16.msra.mxu1 %v1902_v35  ;;  %958 = vmatprep.subr.bf16.mxu0 %v1907_v36  ;;  %v1051_v35 = vld [vmem:[%s2791_s2 + $0x28] sm:$0xff] }
  0x59   :  { %1001 = vmatprep.subr.bf16.mxu1 %v1910_v37  ;;  %v1055_v36 = vpack.c.bf16 %v1051_v35, %v1047_v34  ;;  %v1049_v37 = vld [vmem:[%s2791_s2 + $0x18] sm:$0xff] }
  0x5b   :  { %959 = vmatpush1.bf16.msra.mxu0 %v1905_v38  ;;  %v1053_v38 = vld [vmem:[%s2791_s2 + $0x38] sm:$0xff] }
  0x5c   :  { %1002 = vmatpush1.bf16.msra.mxu1 %v1908_v39  ;;  %960 = vmatprep.subr.bf16.mxu0 %v1913_v43  ;;  %v1057_v39 = vpack.c.bf16 %v1053_v38, %v1049_v37  ;;  %v1988_v43 = vld [vmem:[%s2790_s5 + $0x144] ss:$8 sps:$4 sm:$0xff]  }
  0x5d   :  { %1003 = vmatprep.subr.bf16.mxu1 %v1916_v44  ;;  %v1983_v44 = vld [vmem:[%s2790_s5 + $0x40] ss:$8 sps:$4 sm:$0xff]  }
  0x5f   :  { %961 = vmatpush1.bf16.msra.mxu0 %v1911_v48  ;;  %v1989_v48 = vld [vmem:[%s2790_s5 + $0x30] ss:$8 sps:$4 sm:$0xff]  }
  0x60   :  { %1004 = vmatpush1.bf16.msra.mxu1 %v1914_v49  ;;  %962 = vmatprep.subr.bf16.mxu0 %v1919_v50  ;;  %v1992_v49 = vld [vmem:[%s2790_s5 + $0x130] ss:$8 sps:$4 sm:$0xff]   ;;  %v1997_v50 = vld [vmem:[%s2790_s5 + $0x24] ss:$8 sps:$4 sm:$0xff]  }
  0x61   :  { %1005 = vmatprep.subr.bf16.mxu1 %v1922_v51  ;;  %v2000_v51 = vld [vmem:[%s2790_s5 + $0x124] ss:$8 sps:$4 sm:$0xff]  }
  0x63   :  { %963 = vmatpush2.bf16.msra.mxu0 %v1917_v52  ;;  %v1995_v52 = vld [vmem:[%s2790_s5 + $0x20] ss:$8 sps:$4 sm:$0xff]  }
  0x64   :  { %1006 = vmatpush2.bf16.msra.mxu1 %v1920_v53  ;;  %964 = vmatprep.subr.bf16.mxu0 %v1925_v54  ;;  %v1998_v53 = vld [vmem:[%s2790_s5 + $0x120] ss:$8 sps:$4 sm:$0xff]   ;;  %v2003_v54 = vld [vmem:[%s2790_s5 + $0x14] ss:$8 sps:$4 sm:$0xff]  }
  0x65   :  { %1007 = vmatprep.subr.bf16.mxu1 %v1928_v55  ;;  %v2006_v55 = vld [vmem:[%s2790_s5 + $0x114] ss:$8 sps:$4 sm:$0xff]  }
  0x67   :  { %965 = vmatpush2.bf16.msra.mxu0 %v1923_v56  ;;  %v2001_v56 = vld [vmem:[%s2790_s5 + $0x10] ss:$8 sps:$4 sm:$0xff]  }
  0x68   :  { %1008 = vmatpush2.bf16.msra.mxu1 %v1926_v57  ;;  %966 = vmatprep.subr.bf16.mxu0 %v1931_v58  ;;  %v2004_v57 = vld [vmem:[%s2790_s5 + $0x110] ss:$8 sps:$4 sm:$0xff]   ;;  %v2009_v58 = vld [vmem:[%s2790_s5 + $0x4] ss:$8 sps:$4 sm:$0xff]  }
  0x69   :  { %1009 = vmatprep.subr.bf16.mxu1 %v1934_v59  ;;  %v2012_v59 = vld [vmem:[%s2790_s5 + $0x104] ss:$8 sps:$4 sm:$0xff]  }
  0x6b   :  { %967 = vmatpush2.bf16.msra.mxu0 %v1929_v60  ;;  %v2007_v60 = vld [vmem:[%s2790_s5] ss:$8 sps:$4 sm:$0xff]  }
  0x6c   :  { %1010 = vmatpush2.bf16.msra.mxu1 %v1932_v61  ;;  %968 = vmatprep.subr.bf16.mxu0 %v1937_v62  ;;  %v2010_v61 = vld [vmem:[%s2790_s5 + $0x100] ss:$8 sps:$4 sm:$0xff]   ;;  %v2015_v62 = vld [vmem:[%s2790_s5 + $0xf4] ss:$8 sps:$4 sm:$0xff]  }
  0x6d   :  { %1011 = vmatprep.subr.bf16.mxu1 %v1940_v63  ;;  %v2018_v63 = vld [vmem:[%s2790_s5 + $0x1f4] ss:$8 sps:$4 sm:$0xff]  }
  0x6f   :  { %969 = vmatpush2.bf16.msra.mxu0 %v1935_v0  ;;  %v2013_v0 = vld [vmem:[%s2790_s5 + $0xf0] ss:$8 sps:$4 sm:$0xff]  }
  0x70   :  { %1012 = vmatpush2.bf16.msra.mxu1 %v1938_v1  ;;  %970 = vmatprep.subr.bf16.mxu0 %v1943_v2  ;;  %v2016_v1 = vld [vmem:[%s2790_s5 + $0x1f0] ss:$8 sps:$4 sm:$0xff]   ;;  %v2021_v2 = vld [vmem:[%s2790_s5 + $0xe4] ss:$8 sps:$4 sm:$0xff]  }
  0x71   :  { %1013 = vmatprep.subr.bf16.mxu1 %v1946_v3  ;;  %v2024_v3 = vld [vmem:[%s2790_s5 + $0x1e4] ss:$8 sps:$4 sm:$0xff]  }
  0x73   :  { %971 = vmatpush2.bf16.msra.mxu0 %v1941_v4  ;;  %v2019_v4 = vld [vmem:[%s2790_s5 + $0xe0] ss:$8 sps:$4 sm:$0xff]  }
  0x74   :  { %1014 = vmatpush2.bf16.msra.mxu1 %v1944_v5  ;;  %972 = vmatprep.subr.bf16.mxu0 %v1949_v6  ;;  %v2022_v5 = vld [vmem:[%s2790_s5 + $0x1e0] ss:$8 sps:$4 sm:$0xff]   ;;  %v2027_v6 = vld [vmem:[%s2790_s5 + $0xd4] ss:$8 sps:$4 sm:$0xff]  }
  0x75   :  { %1015 = vmatprep.subr.bf16.mxu1 %v1952_v7  ;;  %v2030_v7 = vld [vmem:[%s2790_s5 + $0x1d4] ss:$8 sps:$4 sm:$0xff]  }
  0x77   :  { %973 = vmatpush2.bf16.msra.mxu0 %v1947_v8  ;;  %v2025_v8 = vld [vmem:[%s2790_s5 + $0xd0] ss:$8 sps:$4 sm:$0xff]  }
  0x78   :  { %1016 = vmatpush2.bf16.msra.mxu1 %v1950_v9  ;;  %974 = vmatprep.subr.bf16.mxu0 %v1955_v10  ;;  %v2028_v9 = vld [vmem:[%s2790_s5 + $0x1d0] ss:$8 sps:$4 sm:$0xff]   ;;  %v2033_v10 = vld [vmem:[%s2790_s5 + $0xc4] ss:$8 sps:$4 sm:$0xff]  }
  0x79   :  { %1017 = vmatprep.subr.bf16.mxu1 %v1958_v11  ;;  %v2036_v11 = vld [vmem:[%s2790_s5 + $0x1c4] ss:$8 sps:$4 sm:$0xff]  }
  0x7b   :  { %975 = vmatpush2.bf16.msra.mxu0 %v1953_v12  ;;  %v2031_v12 = vld [vmem:[%s2790_s5 + $0xc0] ss:$8 sps:$4 sm:$0xff]  }
  0x7c   :  { %1018 = vmatpush2.bf16.msra.mxu1 %v1956_v13  ;;  %976 = vmatprep.subr.bf16.mxu0 %v1961_v14  ;;  %v2034_v13 = vld [vmem:[%s2790_s5 + $0x1c0] ss:$8 sps:$4 sm:$0xff]   ;;  %v2039_v14 = vld [vmem:[%s2790_s5 + $0xb4] ss:$8 sps:$4 sm:$0xff]  }
  0x7d   :  { %1019 = vmatprep.subr.bf16.mxu1 %v1964_v15  ;;  %v2042_v15 = vld [vmem:[%s2790_s5 + $0x1b4] ss:$8 sps:$4 sm:$0xff]  }
  0x7f   :  { %977 = vmatpush2.bf16.msra.mxu0 %v1959_v16  ;;  %v2037_v16 = vld [vmem:[%s2790_s5 + $0xb0] ss:$8 sps:$4 sm:$0xff]  }
  0x80   :  { %1020 = vmatpush2.bf16.msra.mxu1 %v1962_v17  ;;  %1455 = vmatprep.subr.bf16.mxu0 %v1967_v22  ;;  %v2040_v17 = vld [vmem:[%s2790_s5 + $0x1b0] ss:$8 sps:$4 sm:$0xff]   ;;  %v2051_v22 = vld [vmem:[%s2790_s5 + $0x94] ss:$8 sps:$4 sm:$0xff]  }
  0x81   :  { %1498 = vmatprep.subr.bf16.mxu1 %v1970_v23  ;;  %v2054_v23 = vld [vmem:[%s2790_s5 + $0x194] ss:$8 sps:$4 sm:$0xff]  }
  0x82   :  { %979 = vmatmul.mubr.bf16.vlgmr.msra.gmra.mxu0 %v545_v24  ;;  %v2049_v24 = vld [vmem:[%s2790_s5 + $0x90] ss:$8 sps:$4 sm:$0xff]  }
  0x83   :  { %1022 = vmatmul.mubr.bf16.vlgmr.msra.gmra.mxu1 %v547_v25  ;;  %1456 = vmatpush1.bf16.msra.mxu0 %v1965_v26  ;;  %v2052_v25 = vld [vmem:[%s2790_s5 + $0x190] ss:$8 sps:$4 sm:$0xff]   ;;  %v2057_v26 = vld [vmem:[%s2790_s5 + $0x84] ss:$8 sps:$4 sm:$0xff]  }
  0x84   :  { %1499 = vmatpush1.bf16.msra.mxu1 %v1968_v27  ;;  %1457 = vmatprep.subr.bf16.mxu0 %v1973_v28  ;;  %v2060_v27 = vld [vmem:[%s2790_s5 + $0x184] ss:$8 sps:$4 sm:$0xff]   ;;  %v2055_v28 = vld [vmem:[%s2790_s5 + $0x80] ss:$8 sps:$4 sm:$0xff]  }
  0x85   :  { %1500 = vmatprep.subr.bf16.mxu1 %v1976_v29  ;;  %1487 = vmatprep.mubr.bf16.mxu0 %v1055_v36  ;;  %v2058_v29 = vld [vmem:[%s2790_s5 + $0x180] ss:$8 sps:$4 sm:$0xff]   ;;  %v107_v36 = vlaneseq }
  0x86   :  { %1530 = vmatprep.mubr.bf16.mxu1 %v1057_v39  ;;  %v105_v39 = vld [vmem:[%s2792_s6] ss:$4 sm:$0x3] }
  0x87   :  { %1458 = vmatpush1.bf16.msra.mxu0 %v1971_v30  ;;  %v1046_v30 = vld [vmem:[%s2791_s2] sm:$0xff]  ;;  %v108_v37 = vshrl.u32 %v107_v36, 7 }
  0x88   :  { %1501 = vmatpush1.bf16.msra.mxu1 %v1974_v31  ;;  %1459 = vmatprep.subr.bf16.mxu0 %v1979_v32  ;;  %v1050_v31 = vld [vmem:[%s2791_s2 + $0x20] sm:$0xff]  ;;  %v1048_v32 = vld [vmem:[%s2791_s2 + $0x10] sm:$0xff] }
  0x89   :  { %1502 = vmatprep.subr.bf16.mxu1 %v1982_v33  ;;  %v1052_v33 = vld [vmem:[%s2791_s2 + $0x30] sm:$0xff]  ;;  %v1054_v34 = vpack.c.bf16 %v1050_v31, %v1046_v30  ;;  %v109_v38 = vsub.s32 0, %v108_v37 }
  0x8a   :  { %v1056_v35 = vpack.c.bf16 %v1052_v33, %v1048_v32 }
  0x8b   :  { %1460 = vmatpush1.bf16.msra.mxu0 %v1977_v40  ;;  %v113_v40 = vsub.s32 1, %v108_v37 }
  0x8c   :  { %1503 = vmatpush1.bf16.msra.mxu1 %v1980_v41  ;;  %1461 = vmatprep.subr.bf16.mxu0 %v1985_v42  ;;  %v110_v41 = vrot.slane %v105_v39, %v109_v38 }
  0x8d   :  { %1504 = vmatprep.subr.bf16.mxu1 %v1988_v43  ;;  %v114_v42 = vrot.slane %v105_v39, %v113_v40 }
  0x8f   :  { %1462 = vmatpush1.bf16.msra.mxu0 %v1983_v44 }
  0x90   :  { %1505 = vmatpush1.bf16.msra.mxu1 %v1986_v45  ;;  %1463 = vmatprep.subr.bf16.mxu0 %v1991_v46 }
  0x91   :  { %1506 = vmatprep.subr.bf16.mxu1 %v1994_v47 }
  0x93   :  { %1464 = vmatpush1.bf16.msra.mxu0 %v1989_v48 }
  0x94   :  { %1507 = vmatpush1.bf16.msra.mxu1 %v1992_v49  ;;  %1465 = vmatprep.subr.bf16.mxu0 %v1997_v50 }
  0x95   :  { %1508 = vmatprep.subr.bf16.mxu1 %v2000_v51 }
  0x97   :  { %1466 = vmatpush1.bf16.msra.mxu0 %v1995_v52 }
  0x98   :  { %1509 = vmatpush1.bf16.msra.mxu1 %v1998_v53  ;;  %1467 = vmatprep.subr.bf16.mxu0 %v2003_v54 }
  0x99   :  { %1510 = vmatprep.subr.bf16.mxu1 %v2006_v55 }
  0x9b   :  { %1468 = vmatpush1.bf16.msra.mxu0 %v2001_v56 }
  0x9c   :  { %1511 = vmatpush1.bf16.msra.mxu1 %v2004_v57  ;;  %1469 = vmatprep.subr.bf16.mxu0 %v2009_v58 }
  0x9d   :  { %1512 = vmatprep.subr.bf16.mxu1 %v2012_v59 }
  0x9f   :  { %1470 = vmatpush1.bf16.msra.mxu0 %v2007_v60 }
  0xa0   :  { %1513 = vmatpush1.bf16.msra.mxu1 %v2010_v61  ;;  %1471 = vmatprep.subr.bf16.mxu0 %v2015_v62  ;;  %v1633_v61 = vld [vmem:[%s2792_s6 + $0x1] ss:$4 sm:$0x3] }
  0xa1   :  { %1514 = vmatprep.subr.bf16.mxu1 %v2018_v63  ;;  %v619_v62 = vrot.slane %v1633_v61, %v109_v38  ;;  %v623_v63 = vrot.slane %v1633_v61, %v113_v40 }
  0xa3   :  { %1472 = vmatpush2.bf16.msra.mxu0 %v2013_v0 }
  0xa4   :  { %1515 = vmatpush2.bf16.msra.mxu1 %v2016_v1  ;;  %1473 = vmatprep.subr.bf16.mxu0 %v2021_v2 }
  0xa5   :  { %1516 = vmatprep.subr.bf16.mxu1 %v2024_v3 }
  0xa7   :  { %1474 = vmatpush2.bf16.msra.mxu0 %v2019_v4 }
  0xa8   :  { %1517 = vmatpush2.bf16.msra.mxu1 %v2022_v5  ;;  %1475 = vmatprep.subr.bf16.mxu0 %v2027_v6 }
  0xa9   :  { %1518 = vmatprep.subr.bf16.mxu1 %v2030_v7 }
  0xab   :  { %1476 = vmatpush2.bf16.msra.mxu0 %v2025_v8 }
  0xac   :  { %1519 = vmatpush2.bf16.msra.mxu1 %v2028_v9  ;;  %1477 = vmatprep.subr.bf16.mxu0 %v2033_v10 }
  0xad   :  { %1520 = vmatprep.subr.bf16.mxu1 %v2036_v11 }
  0xaf   :  { %1478 = vmatpush2.bf16.msra.mxu0 %v2031_v12 }
  0xb0   :  { %1521 = vmatpush2.bf16.msra.mxu1 %v2034_v13  ;;  %1479 = vmatprep.subr.bf16.mxu0 %v2039_v14 }
  0xb1   :  { %1522 = vmatprep.subr.bf16.mxu1 %v2042_v15 }
  0xb3   :  { %1480 = vmatpush2.bf16.msra.mxu0 %v2037_v16 }
  0xb4   :  { %1523 = vmatpush2.bf16.msra.mxu1 %v2040_v17  ;;  %1481 = vmatprep.subr.bf16.mxu0 %v2045_v18  ;;  %v1700_v18 = vld [vmem:[%s2792_s6 + $0x2] ss:$4 sm:$0x3] }
  0xb5   :  { %1524 = vmatprep.subr.bf16.mxu1 %v2048_v19  ;;  %v1128_v19 = vrot.slane %v1700_v18, %v109_v38 }
  0xb7   :  { %1482 = vmatpush2.bf16.msra.mxu0 %v2043_v20  ;;  %v1132_v20 = vrot.slane %v1700_v18, %v113_v40 }
  0xb8   :  { %1525 = vmatpush2.bf16.msra.mxu1 %v2046_v21  ;;  %1483 = vmatprep.subr.bf16.mxu0 %v2051_v22 }
  0xb9   :  { %1526 = vmatprep.subr.bf16.mxu1 %v2054_v23 }
  0xbb   :  { %1484 = vmatpush2.bf16.msra.mxu0 %v2049_v24 }
  0xbc   :  { %1527 = vmatpush2.bf16.msra.mxu1 %v2052_v25  ;;  %1485 = vmatprep.subr.bf16.mxu0 %v2057_v26 }
  0xbd   :  { %1528 = vmatprep.subr.bf16.mxu1 %v2060_v27 }
  0xbf   :  { %1486 = vmatpush2.bf16.msra.mxu0 %v2055_v28 }
  0xc0   :  { %1529 = vmatpush2.bf16.msra.mxu1 %v2058_v29 }
  0xc2   :  { %1488 = vmatmul.mubr.bf16.vlgmr.msra.gmra.mxu0 %v1054_v34 }
  0xc3   :  { %1531 = vmatmul.mubr.bf16.vlgmr.msra.gmra.mxu1 %v1056_v35 }
 0x102   :  { %v471_v43 = vpop.f32.mrf.mxu0 }
 0x103   :  { %v514_v44 = vpop.f32.mrf.mxu1  ;;  %v472_v45 = vadd.f32 %v471_v43, %v110_v41 }
 0x104   :  { %v473_v46 = vpop.f32.mrf.mxu0 }
 0x105   :  { %v516_v47 = vpop.f32.mrf.mxu1  ;;  %v515_v48 = vadd.f32 %v514_v44, %v472_v45  ;;  %v474_v49 = vadd.f32 %v473_v46, %v114_v42 }
 0x106   :  { %v475_v50 = vpop.f32.mrf.mxu0 }
 0x107   :  { %v518_v51 = vpop.f32.mrf.mxu1  ;;  %v517_v52 = vadd.f32 %v516_v47, %v474_v49  ;;  %v476_v53 = vadd.f32 %v475_v50, %v110_v41 }
 0x108   :  { %v477_v54 = vpop.f32.mrf.mxu0 }
 0x109   :  { %v1767_v55 = vpack.c.bf16 %v517_v52, %v515_v48  ;;  %v478_v56 = vadd.f32 %v477_v54, %v114_v42  ;;  %v520_v57 = vpop.f32.mrf.mxu1  ;;  %v519_v58 = vadd.f32 %v518_v51, %v476_v53 }
 0x10b   :  { %535 = vst [vmem:[%s2793_s7] sm:$0xff] %v1767_v55  ;;  %v521_v59 = vadd.f32 %v520_v57, %v478_v56 }
 0x10d   :  { %v1768_v60 = vpack.c.bf16 %v521_v59, %v519_v58 }
 0x10f   :  { %536 = vst [vmem:[%s2793_s7 + $0x8] sm:$0xff] %v1768_v60 }
 0x142   :  { %v980_v0 = vpop.f32.mrf.mxu0 }
 0x143   :  { %v1023_v1 = vpop.f32.mrf.mxu1  ;;  %v981_v2 = vadd.f32 %v980_v0, %v619_v62 }
 0x144   :  { %v982_v3 = vpop.f32.mrf.mxu0 }
 0x145   :  { %v1025_v4 = vpop.f32.mrf.mxu1  ;;  %v1024_v5 = vadd.f32 %v1023_v1, %v981_v2  ;;  %v983_v6 = vadd.f32 %v982_v3, %v623_v63 }
 0x146   :  { %v984_v7 = vpop.f32.mrf.mxu0 }
 0x147   :  { %v1027_v8 = vpop.f32.mrf.mxu1  ;;  %v1026_v9 = vadd.f32 %v1025_v4, %v983_v6  ;;  %v985_v10 = vadd.f32 %v984_v7, %v619_v62 }
 0x148   :  { %v986_v11 = vpop.f32.mrf.mxu0 }
 0x149   :  { %v1769_v12 = vpack.c.bf16 %v1026_v9, %v1024_v5  ;;  %v987_v13 = vadd.f32 %v986_v11, %v623_v63  ;;  %v1029_v14 = vpop.f32.mrf.mxu1  ;;  %v1028_v15 = vadd.f32 %v1027_v8, %v985_v10 }
 0x14b   :  { %1044 = vst [vmem:[%s2794_s8] sm:$0xff] %v1769_v12  ;;  %v1030_v16 = vadd.f32 %v1029_v14, %v987_v13 }
 0x14d   :  { %v1770_v17 = vpack.c.bf16 %v1030_v16, %v1028_v15 }
 0x14f   :  { %1045 = vst [vmem:[%s2794_s8 + $0x8] sm:$0xff] %v1770_v17 }
 0x182   :  { %v1489_v21 = vpop.f32.mrf.mxu0 }
 0x183   :  { %v1532_v22 = vpop.f32.mrf.mxu1  ;;  %v1490_v23 = vadd.f32 %v1489_v21, %v1128_v19 }
 0x184   :  { %v1491_v24 = vpop.f32.mrf.mxu0 }
 0x185   :  { %v1534_v25 = vpop.f32.mrf.mxu1  ;;  %v1492_v26 = vadd.f32 %v1491_v24, %v1132_v20  ;;  %v1533_v29 = vadd.f32 %v1532_v22, %v1490_v23 }
 0x186   :  { %v1493_v27 = vpop.f32.mrf.mxu0 }
 0x187   :  { %v1536_v28 = vpop.f32.mrf.mxu1  ;;  %v1535_v30 = vadd.f32 %v1534_v25, %v1492_v26  ;;  %v1494_v31 = vadd.f32 %v1493_v27, %v1128_v19 }
 0x188   :  { %v1495_v32 = vpop.f32.mrf.mxu0 }
 0x189   :  { %v1771_v33 = vpack.c.bf16 %v1535_v30, %v1533_v29  ;;  %v1496_v34 = vadd.f32 %v1495_v32, %v1132_v20  ;;  %v1538_v35 = vpop.f32.mrf.mxu1  ;;  %v1537_v36 = vadd.f32 %v1536_v28, %v1494_v31 }
 0x18b   :  { %1553 = vst [vmem:[%s2795_s9] sm:$0xff] %v1771_v33  ;;  %v1539_v37 = vadd.f32 %v1538_v35, %v1496_v34 }
 0x18d   :  { %v1772_v38 = vpack.c.bf16 %v1539_v37, %v1537_v36 }
 0x18f   :  { %1554 = vst [vmem:[%s2795_s9 + $0x8] sm:$0xff] %v1772_v38 }

</bundles_post_ra>
